<compile_context>
chip_gen: v7x
topology: tpu7x:2x2x1
jax: 0.10.0
libtpu: 0.0.40
codegen_flags: <defaults>
</compile_context>

<pallas_src>
import jax
import jax.numpy as jnp
from jax.experimental import pallas as pl
from jax.experimental.pallas import tpu as pltpu

IN_RAW = 28 * 28        # 784
HIDDEN = 512
OUT_RAW = 10
OUT_PAD = 128           # lane-dense output tile (unmasked vst); do NOT pad to 256
NEG_BIG = -1e30         # padded logit lanes -> exp underflows to exactly 0


def mnist_mlp_kernel(x_ref, w1_ref, b1_ref, w2_ref, b2_ref, w3_ref, b3_ref, o_ref):
    # x_ref: (tile_b, 784) f32; weights bf16; biases f32 (1, N); o_ref bf16.
    x = x_ref[...].astype(jnp.bfloat16)                          # cast on VPU (huge slack)

    h1 = jnp.dot(x, w1_ref[...], preferred_element_type=jnp.float32) + b1_ref[...]
    h1 = jnp.maximum(h1, 0.0)                                    # relu(fc1), f32

    h2 = jnp.dot(h1.astype(jnp.bfloat16), w2_ref[...],
                 preferred_element_type=jnp.float32) + b2_ref[...]
    h2 = jnp.maximum(h2, 0.0)                                    # relu(fc2), f32

    logits = jnp.dot(h2.astype(jnp.bfloat16), w3_ref[...],
                     preferred_element_type=jnp.float32) + b3_ref[...]

    # Numerically stable softmax over all 128 lanes; padded lanes carry logit
    # ~ -1e30 so exp(...) == 0 and they contribute nothing to the denominator.
    m = jnp.max(logits, axis=-1, keepdims=True)
    e = jnp.exp(logits - m)
    denom = jnp.sum(e, axis=-1, keepdims=True)
    o_ref[...] = (e / denom).astype(o_ref.dtype)                 # exact normalization


def prepare_params(params):
    """One-time weight prep (PyTorch (out,in) -> (in,out), bf16, fc3 lane pad).

    Do this once next to parameter init, NOT per forward call.
    """
    w1, b1, w2, b2, w3, b3 = params
    w1_t = w1.T.astype(jnp.bfloat16)                                     # (784, 512)
    w2_t = w2.T.astype(jnp.bfloat16)                                     # (512, 512)
    w3_t = jnp.pad(w3.T.astype(jnp.bfloat16),
                   ((0, 0), (0, OUT_PAD - OUT_RAW)))                     # (512, 128)
    b1_2d = b1.reshape(1, -1).astype(jnp.float32)                        # (1, 512)
    b2_2d = b2.reshape(1, -1).astype(jnp.float32)                        # (1, 512)
    b3_2d = jnp.pad(b3.reshape(1, -1).astype(jnp.float32),
                    ((0, 0), (0, OUT_PAD - OUT_RAW)),
                    constant_values=NEG_BIG)                             # (1, 128)
    return (w1_t, b1_2d, w2_t, b2_2d, w3_t, b3_2d)


def _pick_tile_b(B):
    """Adaptive batch tile.

    - tiny B: round up to the bf16 sublane multiple (16), single tile, no
      wasted MXU rows
    - 128 < B <= 1024: pick a tile giving >=2 grid steps so the 'parallel'
      batch axis can shard across both TensorCores on v7x
    - large B: 512-row tiles amortize the ~0.35us/grid-step overhead while the
      double-buffered f32 x tile (+ resident weights) stays well under v5e's
      16 MiB scoped-VMEM default.
    """
    b16 = ((B + 15) // 16) * 16
    if b16 <= 128:
        return b16
    for t in (128, 256, 512):
        if b16 <= 2 * t:
            return t
    return 512


def mnist_net_forward(x_nchw, prepared_params):
    """x_nchw: (B, 1, 28, 28) float32. Returns (B, 10) softmax probabilities."""
    w1_t, b1_2d, w2_t, b2_2d, w3_t, b3_2d = prepared_params
    B = x_nchw.shape[0]

    tile_b = _pick_tile_b(B)
    b_pad = pl.cdiv(B, tile_b) * tile_b

    # x.view(-1, 784); only pad the batch (no feature pad, no wrapper bf16 cast).
    x2d = x_nchw.reshape(B, IN_RAW).astype(jnp.float32)
    if b_pad != B:
        x2d = jnp.pad(x2d, ((0, b_pad - B), (0, 0)))

    grid = (b_pad // tile_b,)
    resident = dict(pipeline_mode=pl.Buffered(1))   # constant-index blocks: 1 buffer

    out = pl.pallas_call(
        mnist_mlp_kernel,
        out_shape=jax.ShapeDtypeStruct((b_pad, OUT_PAD), jnp.bfloat16),
        grid_spec=pltpu.PrefetchScalarGridSpec(
            num_scalar_prefetch=0,
            grid=grid,
            in_specs=[
                pl.BlockSpec((tile_b, IN_RAW), lambda i: (i, 0)),            # x, streamed
                pl.BlockSpec((IN_RAW, HIDDEN), lambda i: (0, 0), **resident),  # w1
                pl.BlockSpec((1, HIDDEN), lambda i: (0, 0), **resident),       # b1
                pl.BlockSpec((HIDDEN, HIDDEN), lambda i: (0, 0), **resident),  # w2
                pl.BlockSpec((1, HIDDEN), lambda i: (0, 0), **resident),       # b2
                pl.BlockSpec((HIDDEN, OUT_PAD), lambda i: (0, 0), **resident), # w3
                pl.BlockSpec((1, OUT_PAD), lambda i: (0, 0), **resident),      # b3
            ],
            out_specs=pl.BlockSpec((tile_b, OUT_PAD), lambda i: (i, 0)),
        ),
        compiler_params=pltpu.CompilerParams(
            dimension_semantics=("parallel",),      # shards batch tiles on v7x megacore
        ),
    )(x2d, w1_t, b1_2d, w2_t, b2_2d, w3_t, b3_2d)

    # Slice fuses under the caller's jax.jit; tiny (B,10) f32 convert keeps the
    # external API dtype matching the PyTorch module while the HBM slab stays bf16.
    return out[:B, :OUT_RAW].astype(jnp.float32)


def init_params(key):
    """Deterministic synthetic parameters with PyTorch Linear shapes."""
    k1, k2, k3, k4, k5, k6 = jax.random.split(key, 6)
    w1 = jax.random.normal(k1, (HIDDEN, IN_RAW), jnp.float32) * (1.0 / jnp.sqrt(float(IN_RAW)))
    b1 = jax.random.normal(k2, (HIDDEN,), jnp.float32) * 0.01
    w2 = jax.random.normal(k3, (HIDDEN, HIDDEN), jnp.float32) * (1.0 / jnp.sqrt(float(HIDDEN)))
    b2 = jax.random.normal(k4, (HIDDEN,), jnp.float32) * 0.01
    w3 = jax.random.normal(k5, (OUT_RAW, HIDDEN), jnp.float32) * (1.0 / jnp.sqrt(float(HIDDEN)))
    b3 = jax.random.normal(k6, (OUT_RAW,), jnp.float32) * 0.01
    return (w1, b1, w2, b2, w3, b3)


def reference_forward(x_nchw, params):
    """Pure-JAX f32 reference matching the PyTorch forward."""
    w1, b1, w2, b2, w3, b3 = params
    x = x_nchw.reshape(x_nchw.shape[0], IN_RAW)
    h1 = jnp.maximum(x @ w1.T + b1, 0.0)
    h2 = jnp.maximum(h1 @ w2.T + b2, 0.0)
    return jax.nn.softmax(h2 @ w3.T + b3, axis=1)


if __name__ == "__main__":
    key = jax.random.PRNGKey(0)
    k_x, k_p = jax.random.split(key)

    B = 8
    x = jax.random.normal(k_x, (B, 1, 28, 28), jnp.float32)  # NCHW, like an MNIST batch
    params = init_params(k_p)
    prepared = prepare_params(params)                         # one-time weight prep

    fwd = jax.jit(mnist_net_forward)                          # pad + kernel + slice fuse
    out = jax.block_until_ready(fwd(x, prepared))

    assert out.shape == (B, OUT_RAW)
    # softmax rows should sum to ~1 (bf16 matmuls/output -> loose tolerance)
    assert jnp.allclose(jnp.sum(out, axis=1), 1.0, atol=1e-2)
    # match the f32 reference within bf16 matmul tolerance
    ref = reference_forward(x, params)
    assert jnp.allclose(out, ref, atol=3e-2), float(jnp.max(jnp.abs(out - ref)))
    print("KERNEL_OK")
</pallas_src>

<mosaic_0001>
module attributes {stable_mosaic.version = 11 : i64} {
  func.func @mnist_mlp_kernel(%arg0: i32, %arg1: memref<16x784xf32, #tpu.memory_space<vmem>>, %arg2: memref<784x512xbf16, #tpu.memory_space<vmem>>, %arg3: memref<1x512xf32, #tpu.memory_space<vmem>>, %arg4: memref<512x512xbf16, #tpu.memory_space<vmem>>, %arg5: memref<1x512xf32, #tpu.memory_space<vmem>>, %arg6: memref<512x128xbf16, #tpu.memory_space<vmem>>, %arg7: memref<1x128xf32, #tpu.memory_space<vmem>>, %arg8: memref<16x128xbf16, #tpu.memory_space<vmem>>) attributes {dimension_semantics = [#tpu.dimension_semantics<parallel>], iteration_bounds = array<i64: 1>, scalar_prefetch = 0 : i64, scratch_operands = 0 : i64, tpu.core_type = #tpu.core_type<tc>, window_params = [{transform_indices = @transform_0, window_bounds = array<i64: 16, 784>}, {pipeline_mode = #tpu.pipeline_mode<synchronous>, transform_indices = @transform_1, window_bounds = array<i64: 784, 512>}, {pipeline_mode = #tpu.pipeline_mode<synchronous>, transform_indices = @transform_2, window_bounds = array<i64: 1, 512>}, {pipeline_mode = #tpu.pipeline_mode<synchronous>, transform_indices = @transform_3, window_bounds = array<i64: 512, 512>}, {pipeline_mode = #tpu.pipeline_mode<synchronous>, transform_indices = @transform_4, window_bounds = array<i64: 1, 512>}, {pipeline_mode = #tpu.pipeline_mode<synchronous>, transform_indices = @transform_5, window_bounds = array<i64: 512, 128>}, {pipeline_mode = #tpu.pipeline_mode<synchronous>, transform_indices = @transform_6, window_bounds = array<i64: 1, 128>}, {transform_indices = @transform_7, window_bounds = array<i64: 16, 128>}]} {
    %c0 = arith.constant 0 : index
    %c0_0 = arith.constant 0 : index
    %0 = vector.load %arg1[%c0, %c0_0] : memref<16x784xf32, #tpu.memory_space<vmem>>, vector<16x784xf32>
    %1 = arith.truncf %0 : vector<16x784xf32> to vector<16x784xbf16>
    %c0_1 = arith.constant 0 : index
    %c0_2 = arith.constant 0 : index
    %2 = vector.load %arg2[%c0_1, %c0_2] : memref<784x512xbf16, #tpu.memory_space<vmem>>, vector<784x512xbf16>
    %cst = arith.constant dense<0.000000e+00> : vector<16x512xf32>
    %3 = tpu.matmul %1, %2, %cst {dimension_numbers = #tpu.dot_dimension_numbers<[1], [0], [0], [1], [0, 0, 1, 1], [], []>} : vector<16x784xbf16>, vector<784x512xbf16>, vector<16x512xf32> -> vector<16x512xf32>
    %c0_3 = arith.constant 0 : index
    %c0_4 = arith.constant 0 : index
    %4 = vector.load %arg3[%c0_3, %c0_4] : memref<1x512xf32, #tpu.memory_space<vmem>>, vector<1x512xf32>
    %5 = vector.broadcast %4 : vector<1x512xf32> to vector<16x512xf32>
    %6 = arith.addf %3, %5 : vector<16x512xf32>
    %cst_5 = arith.constant 0.000000e+00 : f32
    %7 = vector.broadcast %cst_5 : f32 to vector<16x512xf32>
    %8 = arith.maximumf %6, %7 : vector<16x512xf32>
    %9 = arith.truncf %8 : vector<16x512xf32> to vector<16x512xbf16>
    %c0_6 = arith.constant 0 : index
    %c0_7 = arith.constant 0 : index
    %10 = vector.load %arg4[%c0_6, %c0_7] : memref<512x512xbf16, #tpu.memory_space<vmem>>, vector<512x512xbf16>
    %cst_8 = arith.constant dense<0.000000e+00> : vector<16x512xf32>
    %11 = tpu.matmul %9, %10, %cst_8 {dimension_numbers = #tpu.dot_dimension_numbers<[1], [0], [0], [1], [0, 0, 1, 1], [], []>} : vector<16x512xbf16>, vector<512x512xbf16>, vector<16x512xf32> -> vector<16x512xf32>
    %c0_9 = arith.constant 0 : index
    %c0_10 = arith.constant 0 : index
    %12 = vector.load %arg5[%c0_9, %c0_10] : memref<1x512xf32, #tpu.memory_space<vmem>>, vector<1x512xf32>
    %13 = vector.broadcast %12 : vector<1x512xf32> to vector<16x512xf32>
    %14 = arith.addf %11, %13 : vector<16x512xf32>
    %cst_11 = arith.constant 0.000000e+00 : f32
    %15 = vector.broadcast %cst_11 : f32 to vector<16x512xf32>
    %16 = arith.maximumf %14, %15 : vector<16x512xf32>
    %17 = arith.truncf %16 : vector<16x512xf32> to vector<16x512xbf16>
    %c0_12 = arith.constant 0 : index
    %c0_13 = arith.constant 0 : index
    %18 = vector.load %arg6[%c0_12, %c0_13] : memref<512x128xbf16, #tpu.memory_space<vmem>>, vector<512x128xbf16>
    %cst_14 = arith.constant dense<0.000000e+00> : vector<16x128xf32>
    %19 = tpu.matmul %17, %18, %cst_14 {dimension_numbers = #tpu.dot_dimension_numbers<[1], [0], [0], [1], [0, 0, 1, 1], [], []>} : vector<16x512xbf16>, vector<512x128xbf16>, vector<16x128xf32> -> vector<16x128xf32>
    %c0_15 = arith.constant 0 : index
    %c0_16 = arith.constant 0 : index
    %20 = vector.load %arg7[%c0_15, %c0_16] : memref<1x128xf32, #tpu.memory_space<vmem>>, vector<1x128xf32>
    %21 = vector.broadcast %20 : vector<1x128xf32> to vector<16x128xf32>
    %22 = arith.addf %19, %21 : vector<16x128xf32>
    %cst_17 = arith.constant dense<0xFF800000> : vector<16xf32>
    %23 = vector.multi_reduction <maximumf>, %22, %cst_17 [1] : vector<16x128xf32> to vector<16xf32>
    %24 = vector.shape_cast %23 : vector<16xf32> to vector<16x1xf32>
    %25 = vector.broadcast %24 : vector<16x1xf32> to vector<16x128xf32>
    %26 = arith.subf %22, %25 : vector<16x128xf32>
    %27 = math.exp %26 : vector<16x128xf32>
    %cst_18 = arith.constant dense<0.000000e+00> : vector<16xf32>
    %28 = vector.multi_reduction <add>, %27, %cst_18 [1] : vector<16x128xf32> to vector<16xf32>
    %29 = vector.shape_cast %28 : vector<16xf32> to vector<16x1xf32>
    %30 = vector.broadcast %29 : vector<16x1xf32> to vector<16x128xf32>
    %31 = arith.divf %27, %30 : vector<16x128xf32>
    %32 = arith.truncf %31 : vector<16x128xf32> to vector<16x128xbf16>
    %c0_19 = arith.constant 0 : index
    %c0_20 = arith.constant 0 : index
    %33 = vector.load %arg8[%c0_19, %c0_20] : memref<16x128xbf16, #tpu.memory_space<vmem>>, vector<16x128xbf16>
    tpu.vector_store %arg8[%c0_19, %c0_20], %32 {strides = array<i32>} : memref<16x128xbf16, #tpu.memory_space<vmem>>, vector<16x128xbf16>,
    return
  }
  func.func @transform_0(%arg0: i32) -> (i32, i32) {
    %c0_i32 = arith.constant 0 : i32
    %c0_i32_0 = arith.constant 0 : i32
    return %arg0, %c0_i32 : i32, i32
  }
  func.func @transform_1(%arg0: i32) -> (i32, i32) {
    %c0_i32 = arith.constant 0 : i32
    %c0_i32_0 = arith.constant 0 : i32
    %c0_i32_1 = arith.constant 0 : i32
    return %c0_i32, %c0_i32_0 : i32, i32
  }
  func.func @transform_2(%arg0: i32) -> (i32, i32) {
    %c0_i32 = arith.constant 0 : i32
    %c0_i32_0 = arith.constant 0 : i32
    %c0_i32_1 = arith.constant 0 : i32
    return %c0_i32, %c0_i32_0 : i32, i32
  }
  func.func @transform_3(%arg0: i32) -> (i32, i32) {
    %c0_i32 = arith.constant 0 : i32
    %c0_i32_0 = arith.constant 0 : i32
    %c0_i32_1 = arith.constant 0 : i32
    return %c0_i32, %c0_i32_0 : i32, i32
  }
  func.func @transform_4(%arg0: i32) -> (i32, i32) {
    %c0_i32 = arith.constant 0 : i32
    %c0_i32_0 = arith.constant 0 : i32
    %c0_i32_1 = arith.constant 0 : i32
    return %c0_i32, %c0_i32_0 : i32, i32
  }
  func.func @transform_5(%arg0: i32) -> (i32, i32) {
    %c0_i32 = arith.constant 0 : i32
    %c0_i32_0 = arith.constant 0 : i32
    %c0_i32_1 = arith.constant 0 : i32
    return %c0_i32, %c0_i32_0 : i32, i32
  }
  func.func @transform_6(%arg0: i32) -> (i32, i32) {
    %c0_i32 = arith.constant 0 : i32
    %c0_i32_0 = arith.constant 0 : i32
    %c0_i32_1 = arith.constant 0 : i32
    return %c0_i32, %c0_i32_0 : i32, i32
  }
  func.func @transform_7(%arg0: i32) -> (i32, i32) {
    %c0_i32 = arith.constant 0 : i32
    %c0_i32_0 = arith.constant 0 : i32
    return %arg0, %c0_i32 : i32, i32
  }
}

</mosaic_0001>

<bundles_post_ra>
// kernel: mnist_net_forward.1
= control target key start
LH: loop header
LB: loop body
LE: loop exit
PB: predicated region body
PF: predicated region fallthrough
CT: control target
= control target key end

     0   :  { %12 = vsyncpa [#allocation3], 0  ;;  %s4273_s0 = inlined_call_operand.vmem [shape: f32[16,784], index: 0, kind: input, shape index: {}]   ;;  %s4274_s1 = inlined_call_operand.hbm [shape: bf16[784,512], index: 1, kind: input, shape index: {}]   ;;  %s4275_s2 = inlined_call_operand.vmem [shape: f32[1,512], index: 2, kind: input, shape index: {}]   ;;  %s4276_s3 = inlined_call_operand.hbm [shape: bf16[512,512], index: 3, kind: input, shape index: {}]   ;;  %s4277_s4 = inlined_call_operand.vmem [shape: f32[1,512], index: 4, kind: input, shape index: {}]   ;;  %s4278_s5 = inlined_call_operand.vmem [shape: bf16[512,128], index: 5, kind: input, shape index: {}]   ;;  %s4279_s6 = inlined_call_operand.vmem [shape: f32[1,128], index: 6, kind: input, shape index: {}]   ;;  %s4280_s7 = inlined_call_operand.vmem [shape: bf16[16,128], index: 7, kind: output, shape index: {}]  }
   0x1   :  { %13 = vsyncpa [#allocation5], 0  ;;  %s4026_s24 = smov [#allocation2]   ;;  %s3978_s28 = scalar_lea.hbm %s4274_s1, 25088 }
   0x2   :  { %s21_s25 = sshll.u32 %s4026_s24, 4  ;;  %p3979_p0 = scmp.ne.s32.totalorder %s4274_s1, %s3978_s28  ;;  %s22_s25 = int_to_ptr.vmem [resolvable:$true] %s21_s25 }
   0x3   :  { %p3982_p1 = scmp.lt.u32.totalorder %s3978_s28, %s4274_s1 }
   0x5   :  { %p3984_p2 = pnand %p3982_p1, %p3979_p0 }
   0x7   :  { %3987 = shalt.err (!%p3984_p2)
}
   0x8   :  { %s3988_s10 = scalar_lea.vmem %s22_s25, 25088  ;;  %p3993_p4 = scmp.lt.s32.totalorder %s22_s25, %s22_s25 }
   0x9   :  { %p3989_p3 = scmp.ne.s32.totalorder %s22_s25, %s3988_s10  ;;  %p3994_p5 = scmp.lt.s32.totalorder %s3988_s10, %s3988_s10 }
   0xb   :  { %p3995_p6 = por %p3994_p5, %p3993_p4 }
   0xd   :  { %p3996_p7 = pnand %p3995_p6, %p3989_p3 }
   0xf   :  { %3999 = shalt.err (!%p3996_p7)
}
  0x10   :  { %s4027_s11 = smov 256   ;;  %s4028_s12 = smov 16  }
  0x11   :  { %27 = dma.hbm_to_vmem [thread:$0]  %s4274_s1, 25088, %s22_s25, [#allocation3], %s4027_s11, %s4027_s11, %s4028_s12  }
  0x12   :  { %s4029_s15 = smov [#allocation4]   ;;  %s4000_s19 = scalar_lea.hbm %s4276_s3, 16384 }
  0x13   :  { %s35_s16 = sshll.u32 %s4029_s15, 4  ;;  %p4001_p8 = scmp.ne.s32.totalorder %s4276_s3, %s4000_s19  ;;  %s36_s16 = int_to_ptr.vmem [resolvable:$true] %s35_s16 }
  0x14   :  { %p4004_p9 = scmp.lt.u32.totalorder %s4000_s19, %s4276_s3 }
  0x16   :  { %p4006_p10 = pnand %p4004_p9, %p4001_p8 }
  0x18   :  { %4009 = shalt.err (!%p4006_p10)
}
  0x19   :  { %s4010_s24 = scalar_lea.vmem %s36_s16, 16384  ;;  %p4015_p12 = scmp.lt.s32.totalorder %s36_s16, %s36_s16 }
  0x1a   :  { %p4011_p11 = scmp.ne.s32.totalorder %s36_s16, %s4010_s24  ;;  %p4016_p13 = scmp.lt.s32.totalorder %s4010_s24, %s4010_s24 }
  0x1c   :  { %p4017_p0 = por %p4016_p13, %p4015_p12 }
  0x1e   :  { %p4018_p1 = pnand %p4017_p0, %p4011_p11 }
  0x20   :  { %4021 = shalt.err (!%p4018_p1)
}
  0x21   :  { %41 = dma.hbm_to_vmem [thread:$0]  %s4276_s3, 16384, %s36_s16, [#allocation5], %s4027_s11, %s4027_s11, %s4028_s12  }
  0x22   :  { %4022 = dma.done.wait [#allocation3], 25088  }
  0x23   :  { %4023 = vsyncadd [#allocation3], 4294942208 }
  0x24   :  { %4024 = dma.done.wait [#allocation5], 16384  }
  0x25   :  { %4025 = vsyncadd [#allocation5], 4294950912  ;;  %v3452_v0 = vld [vmem:[#allocation2 + $0x4] ss:$16 sps:$4 sm:$0xff]   ;;  %v3454_v1 = vld [vmem:[#allocation2 + $0xc] ss:$16 sps:$4 sm:$0xff]  }
  0x26   :  { %1278 = vmatprep.subr.bf16.mxu0 %v3452_v0  ;;  %v3456_v2 = vld [vmem:[#allocation2] ss:$16 sps:$4 sm:$0xff]   ;;  %v3457_v3 = vld [vmem:[#allocation2 + $0x8] ss:$16 sps:$4 sm:$0xff]   ;;  %1450 = vmatprep.subr.bf16.mxu1 %v3454_v1  ;;  %v3458_v4 = vld [vmem:[#allocation2 + $0x24] ss:$16 sps:$4 sm:$0xff]  }
  0x27   :  { %1279 = vmatpush1.bf16.msra.mxu0 %v3456_v2  ;;  %1451 = vmatpush1.bf16.msra.mxu1 %v3457_v3  ;;  %v3460_v5 = vld [vmem:[#allocation2 + $0x2c] ss:$16 sps:$4 sm:$0xff]   ;;  %v3462_v6 = vld [vmem:[#allocation2 + $0x20] ss:$16 sps:$4 sm:$0xff]   ;;  %v3463_v7 = vld [vmem:[#allocation2 + $0x28] ss:$16 sps:$4 sm:$0xff]  }
  0x28   :  { %1280 = vmatprep.subr.bf16.mxu0 %v3458_v4  ;;  %1452 = vmatprep.subr.bf16.mxu1 %v3460_v5  ;;  %v3464_v8 = vld [vmem:[#allocation2 + $0x44] ss:$16 sps:$4 sm:$0xff]   ;;  %v3466_v9 = vld [vmem:[#allocation2 + $0x4c] ss:$16 sps:$4 sm:$0xff]   ;;  %v3468_v10 = vld [vmem:[#allocation2 + $0x40] ss:$16 sps:$4 sm:$0xff]  }
  0x29   :  { %v3469_v11 = vld [vmem:[#allocation2 + $0x48] ss:$16 sps:$4 sm:$0xff]   ;;  %v3470_v12 = vld [vmem:[#allocation2 + $0x64] ss:$16 sps:$4 sm:$0xff]   ;;  %v3472_v13 = vld [vmem:[#allocation2 + $0x6c] ss:$16 sps:$4 sm:$0xff]  }
  0x2a   :  { %v3474_v14 = vld [vmem:[#allocation2 + $0x60] ss:$16 sps:$4 sm:$0xff]   ;;  %v3475_v15 = vld [vmem:[#allocation2 + $0x68] ss:$16 sps:$4 sm:$0xff]   ;;  %v3476_v16 = vld [vmem:[#allocation2 + $0x84] ss:$16 sps:$4 sm:$0xff]  }
  0x2b   :  { %1281 = vmatpush1.bf16.msra.mxu0 %v3462_v6  ;;  %1453 = vmatpush1.bf16.msra.mxu1 %v3463_v7  ;;  %v3478_v17 = vld [vmem:[#allocation2 + $0x8c] ss:$16 sps:$4 sm:$0xff]   ;;  %v3480_v18 = vld [vmem:[#allocation2 + $0x80] ss:$16 sps:$4 sm:$0xff]   ;;  %v3481_v19 = vld [vmem:[#allocation2 + $0x88] ss:$16 sps:$4 sm:$0xff]  }
  0x2c   :  { %1282 = vmatprep.subr.bf16.mxu0 %v3464_v8  ;;  %1454 = vmatprep.subr.bf16.mxu1 %v3466_v9  ;;  %v3482_v20 = vld [vmem:[#allocation2 + $0xa4] ss:$16 sps:$4 sm:$0xff]   ;;  %v3484_v21 = vld [vmem:[#allocation2 + $0xac] ss:$16 sps:$4 sm:$0xff]   ;;  %v3486_v22 = vld [vmem:[#allocation2 + $0xa0] ss:$16 sps:$4 sm:$0xff]  }
  0x2d   :  { %v3487_v23 = vld [vmem:[#allocation2 + $0xa8] ss:$16 sps:$4 sm:$0xff]   ;;  %v3488_v24 = vld [vmem:[#allocation2 + $0xc4] ss:$16 sps:$4 sm:$0xff]   ;;  %v3490_v25 = vld [vmem:[#allocation2 + $0xcc] ss:$16 sps:$4 sm:$0xff]  }
  0x2e   :  { %v3492_v26 = vld [vmem:[#allocation2 + $0xc0] ss:$16 sps:$4 sm:$0xff]   ;;  %v3493_v27 = vld [vmem:[#allocation2 + $0xc8] ss:$16 sps:$4 sm:$0xff]   ;;  %v3494_v28 = vld [vmem:[#allocation2 + $0xe4] ss:$16 sps:$4 sm:$0xff]  }
  0x2f   :  { %1283 = vmatpush1.bf16.msra.mxu0 %v3468_v10  ;;  %1455 = vmatpush1.bf16.msra.mxu1 %v3469_v11  ;;  %v3496_v29 = vld [vmem:[#allocation2 + $0xec] ss:$16 sps:$4 sm:$0xff]   ;;  %v3498_v30 = vld [vmem:[#allocation2 + $0xe0] ss:$16 sps:$4 sm:$0xff]   ;;  %v3499_v31 = vld [vmem:[#allocation2 + $0xe8] ss:$16 sps:$4 sm:$0xff]  }
  0x30   :  { %1284 = vmatprep.subr.bf16.mxu0 %v3470_v12  ;;  %1456 = vmatprep.subr.bf16.mxu1 %v3472_v13  ;;  %v3500_v32 = vld [vmem:[#allocation2 + $0x104] ss:$16 sps:$4 sm:$0xff]   ;;  %v3502_v33 = vld [vmem:[#allocation2 + $0x10c] ss:$16 sps:$4 sm:$0xff]   ;;  %v3504_v34 = vld [vmem:[#allocation2 + $0x100] ss:$16 sps:$4 sm:$0xff]  }
  0x31   :  { %v3505_v35 = vld [vmem:[#allocation2 + $0x108] ss:$16 sps:$4 sm:$0xff]   ;;  %v3506_v36 = vld [vmem:[#allocation2 + $0x124] ss:$16 sps:$4 sm:$0xff]   ;;  %v3508_v37 = vld [vmem:[#allocation2 + $0x12c] ss:$16 sps:$4 sm:$0xff]  }
  0x32   :  { %v3510_v38 = vld [vmem:[#allocation2 + $0x120] ss:$16 sps:$4 sm:$0xff]   ;;  %v3511_v39 = vld [vmem:[#allocation2 + $0x128] ss:$16 sps:$4 sm:$0xff]   ;;  %v3512_v40 = vld [vmem:[#allocation2 + $0x144] ss:$16 sps:$4 sm:$0xff]  }
  0x33   :  { %1285 = vmatpush1.bf16.msra.mxu0 %v3474_v14  ;;  %1457 = vmatpush1.bf16.msra.mxu1 %v3475_v15  ;;  %v3514_v41 = vld [vmem:[#allocation2 + $0x14c] ss:$16 sps:$4 sm:$0xff]   ;;  %v3516_v42 = vld [vmem:[#allocation2 + $0x140] ss:$16 sps:$4 sm:$0xff]   ;;  %v3517_v43 = vld [vmem:[#allocation2 + $0x148] ss:$16 sps:$4 sm:$0xff]  }
  0x34   :  { %1286 = vmatprep.subr.bf16.mxu0 %v3476_v16  ;;  %1458 = vmatprep.subr.bf16.mxu1 %v3478_v17  ;;  %v3518_v44 = vld [vmem:[#allocation2 + $0x164] ss:$16 sps:$4 sm:$0xff]   ;;  %v3520_v45 = vld [vmem:[#allocation2 + $0x16c] ss:$16 sps:$4 sm:$0xff]   ;;  %v3522_v48 = vld [vmem:[#allocation2 + $0x160] ss:$16 sps:$4 sm:$0xff]  }
  0x35   :  { %v56_v46 = vld [vmem:[%s4273_s0 + $0x8] sm:$0xff]  ;;  %v63_v47 = vld [vmem:[%s4273_s0 + $0x40] sm:$0xff]  ;;  %v62_v5 = vld [vmem:[%s4273_s0 + $0x38] sm:$0xff]  ;;  %vm1274_vm0 = vcmask 130048  }
  0x36   :  { %v3523_v49 = vld [vmem:[#allocation2 + $0x168] ss:$16 sps:$4 sm:$0xff]   ;;  %v70_v50 = vpack.c.bf16 %v63_v47, %v56_v46  ;;  %v3524_v51 = vld [vmem:[#allocation2 + $0x184] ss:$16 sps:$4 sm:$0xff]   ;;  %v3526_v52 = vld [vmem:[#allocation2 + $0x18c] ss:$16 sps:$4 sm:$0xff]  }
  0x37   :  { %1287 = vmatpush1.bf16.msra.mxu0 %v3480_v18  ;;  %1459 = vmatpush1.bf16.msra.mxu1 %v3481_v19  ;;  %v3528_v53 = vld [vmem:[#allocation2 + $0x180] ss:$16 sps:$4 sm:$0xff]   ;;  %v3529_v54 = vld [vmem:[#allocation2 + $0x188] ss:$16 sps:$4 sm:$0xff]   ;;  %v3530_v55 = vld [vmem:[#allocation2 + $0x1a4] ss:$16 sps:$4 sm:$0xff]  }
  0x38   :  { %1288 = vmatprep.subr.bf16.mxu0 %v3482_v20  ;;  %1460 = vmatprep.subr.bf16.mxu1 %v3484_v21  ;;  %v3532_v56 = vld [vmem:[#allocation2 + $0x1ac] ss:$16 sps:$4 sm:$0xff]   ;;  %v3534_v57 = vld [vmem:[#allocation2 + $0x1a0] ss:$16 sps:$4 sm:$0xff]   ;;  %v3535_v58 = vld [vmem:[#allocation2 + $0x1a8] ss:$16 sps:$4 sm:$0xff]  }
  0x39   :  { %1310 = vmatprep.mubr.bf16.mxu0 %v70_v50  ;;  %1482 = vmatprep.mubr.bf16.mxu1 %v70_v50  ;;  %v3536_v59 = vld [vmem:[#allocation2 + $0x1c4] ss:$16 sps:$4 sm:$0xff]   ;;  %v3538_v60 = vld [vmem:[#allocation2 + $0x1cc] ss:$16 sps:$4 sm:$0xff]   ;;  %v3540_v61 = vld [vmem:[#allocation2 + $0x1c0] ss:$16 sps:$4 sm:$0xff]  }
  0x3a   :  { %v3541_v62 = vld [vmem:[#allocation2 + $0x1c8] ss:$16 sps:$4 sm:$0xff]   ;;  %v3542_v63 = vld [vmem:[#allocation2 + $0x1e4] ss:$16 sps:$4 sm:$0xff]   ;;  %v3544_v0 = vld [vmem:[#allocation2 + $0x1ec] ss:$16 sps:$4 sm:$0xff]  }
  0x3b   :  { %1289 = vmatpush1.bf16.msra.mxu0 %v3486_v22  ;;  %1461 = vmatpush1.bf16.msra.mxu1 %v3487_v23  ;;  %v3546_v1 = vld [vmem:[#allocation2 + $0x1e0] ss:$16 sps:$4 sm:$0xff]   ;;  %v3547_v2 = vld [vmem:[#allocation2 + $0x1e8] ss:$16 sps:$4 sm:$0xff]   ;;  %v3550_v3 = vld [vmem:[#allocation2 + $0x204] ss:$16 sps:$4 sm:$0xff]  }
  0x3c   :  { %1290 = vmatprep.subr.bf16.mxu0 %v3488_v24  ;;  %1462 = vmatprep.subr.bf16.mxu1 %v3490_v25  ;;  %v55_v4 = vld [vmem:[%s4273_s0] sm:$0xff]  ;;  %v3553_v6 = vld [vmem:[#allocation2 + $0x20c] ss:$16 sps:$4 sm:$0xff]   ;;  %v3551_v8 = vld [vmem:[#allocation2 + $0x208] ss:$16 sps:$4 sm:$0xff]  }
  0x3d   :  { %v3548_v7 = vld [vmem:[#allocation2 + $0x200] ss:$16 sps:$4 sm:$0xff]   ;;  %v69_v9 = vpack.c.bf16 %v62_v5, %v55_v4  ;;  %v3556_v10 = vld [vmem:[#allocation2 + $0x224] ss:$16 sps:$4 sm:$0xff]   ;;  %v3559_v11 = vld [vmem:[#allocation2 + $0x22c] ss:$16 sps:$4 sm:$0xff]  }
  0x3e   :  { %v3554_v12 = vld [vmem:[#allocation2 + $0x220] ss:$16 sps:$4 sm:$0xff]   ;;  %v3557_v13 = vld [vmem:[#allocation2 + $0x228] ss:$16 sps:$4 sm:$0xff]   ;;  %v3562_v14 = vld [vmem:[#allocation2 + $0x244] ss:$16 sps:$4 sm:$0xff]  }
  0x3f   :  { %1291 = vmatpush1.bf16.msra.mxu0 %v3492_v26  ;;  %1463 = vmatpush1.bf16.msra.mxu1 %v3493_v27  ;;  %v3565_v15 = vld [vmem:[#allocation2 + $0x24c] ss:$16 sps:$4 sm:$0xff]   ;;  %v3560_v16 = vld [vmem:[#allocation2 + $0x240] ss:$16 sps:$4 sm:$0xff]   ;;  %v3563_v17 = vld [vmem:[#allocation2 + $0x248] ss:$16 sps:$4 sm:$0xff]  }
  0x40   :  { %1292 = vmatprep.subr.bf16.mxu0 %v3494_v28  ;;  %1464 = vmatprep.subr.bf16.mxu1 %v3496_v29  ;;  %v3568_v18 = vld [vmem:[#allocation2 + $0x264] ss:$16 sps:$4 sm:$0xff]   ;;  %v3571_v19 = vld [vmem:[#allocation2 + $0x26c] ss:$16 sps:$4 sm:$0xff]   ;;  %v3566_v20 = vld [vmem:[#allocation2 + $0x260] ss:$16 sps:$4 sm:$0xff]  }
  0x41   :  { %v3569_v21 = vld [vmem:[#allocation2 + $0x268] ss:$16 sps:$4 sm:$0xff]   ;;  %v3574_v22 = vld [vmem:[#allocation2 + $0x284] ss:$16 sps:$4 sm:$0xff]   ;;  %v3577_v23 = vld [vmem:[#allocation2 + $0x28c] ss:$16 sps:$4 sm:$0xff]  }
  0x42   :  { %v3572_v24 = vld [vmem:[#allocation2 + $0x280] ss:$16 sps:$4 sm:$0xff]   ;;  %v3575_v25 = vld [vmem:[#allocation2 + $0x288] ss:$16 sps:$4 sm:$0xff]   ;;  %v3580_v26 = vld [vmem:[#allocation2 + $0x2a4] ss:$16 sps:$4 sm:$0xff]  }
  0x43   :  { %1293 = vmatpush1.bf16.msra.mxu0 %v3498_v30  ;;  %1465 = vmatpush1.bf16.msra.mxu1 %v3499_v31  ;;  %v3583_v27 = vld [vmem:[#allocation2 + $0x2ac] ss:$16 sps:$4 sm:$0xff]   ;;  %v3578_v28 = vld [vmem:[#allocation2 + $0x2a0] ss:$16 sps:$4 sm:$0xff]   ;;  %v3581_v29 = vld [vmem:[#allocation2 + $0x2a8] ss:$16 sps:$4 sm:$0xff]  }
  0x44   :  { %1294 = vmatprep.subr.bf16.mxu0 %v3500_v32  ;;  %1466 = vmatprep.subr.bf16.mxu1 %v3502_v33  ;;  %v3586_v30 = vld [vmem:[#allocation2 + $0x2c4] ss:$16 sps:$4 sm:$0xff]   ;;  %v3589_v31 = vld [vmem:[#allocation2 + $0x2cc] ss:$16 sps:$4 sm:$0xff]   ;;  %v3602_v47 = vld [vmem:[#allocation2 + $0x320] ss:$16 sps:$4 sm:$0xff]  }
  0x45   :  { %v58_v32 = vld [vmem:[%s4273_s0 + $0x18] sm:$0xff]  ;;  %v65_v33 = vld [vmem:[%s4273_s0 + $0x50] sm:$0xff] }
  0x46   :  { %v3607_v46 = vld [vmem:[#allocation2 + $0x32c] ss:$16 sps:$4 sm:$0xff]   ;;  %v3635_v4 = vld [vmem:[#allocation2 + $0x3c8] ss:$16 sps:$4 sm:$0xff]   ;;  %v3640_v5 = vld [vmem:[#allocation2 + $0x3e4] ss:$16 sps:$4 sm:$0xff]  }
  0x47   :  { %1295 = vmatpush1.bf16.msra.mxu0 %v3504_v34  ;;  %1467 = vmatpush1.bf16.msra.mxu1 %v3505_v35  ;;  %v3584_v34 = vld [vmem:[#allocation2 + $0x2c0] ss:$16 sps:$4 sm:$0xff]   ;;  %v3587_v35 = vld [vmem:[#allocation2 + $0x2c8] ss:$16 sps:$4 sm:$0xff]   ;;  %v3613_v50 = vld [vmem:[#allocation2 + $0x34c] ss:$16 sps:$4 sm:$0xff]  }
  0x48   :  { %1296 = vmatprep.subr.bf16.mxu0 %v3506_v36  ;;  %1468 = vmatprep.subr.bf16.mxu1 %v3508_v37  ;;  %v72_v36 = vpack.c.bf16 %v65_v33, %v58_v32  ;;  %v3592_v37 = vld [vmem:[#allocation2 + $0x2e4] ss:$16 sps:$4 sm:$0xff]   ;;  %v3673_v32 = vld [vmem:[#allocation2 + $0x48c] ss:$16 sps:$4 sm:$0xff]   ;;  %v3668_v33 = vld [vmem:[#allocation2 + $0x480] ss:$16 sps:$4 sm:$0xff]  }
  0x4b   :  { %1297 = vmatpush1.bf16.msra.mxu0 %v3510_v38  ;;  %1469 = vmatpush1.bf16.msra.mxu1 %v3511_v39  ;;  %v3595_v38 = vld [vmem:[#allocation2 + $0x2ec] ss:$16 sps:$4 sm:$0xff]   ;;  %v3590_v39 = vld [vmem:[#allocation2 + $0x2e0] ss:$16 sps:$4 sm:$0xff]  }
  0x4c   :  { %1298 = vmatprep.subr.bf16.mxu0 %v3512_v40  ;;  %1470 = vmatprep.subr.bf16.mxu1 %v3514_v41  ;;  %v3593_v40 = vld [vmem:[#allocation2 + $0x2e8] ss:$16 sps:$4 sm:$0xff]   ;;  %v3598_v41 = vld [vmem:[#allocation2 + $0x304] ss:$16 sps:$4 sm:$0xff]  }
  0x4f   :  { %1299 = vmatpush1.bf16.msra.mxu0 %v3516_v42  ;;  %1471 = vmatpush1.bf16.msra.mxu1 %v3517_v43  ;;  %v3601_v42 = vld [vmem:[#allocation2 + $0x30c] ss:$16 sps:$4 sm:$0xff]   ;;  %v3596_v43 = vld [vmem:[#allocation2 + $0x300] ss:$16 sps:$4 sm:$0xff]  }
  0x50   :  { %1300 = vmatprep.subr.bf16.mxu0 %v3518_v44  ;;  %1472 = vmatprep.subr.bf16.mxu1 %v3520_v45  ;;  %v3599_v44 = vld [vmem:[#allocation2 + $0x308] ss:$16 sps:$4 sm:$0xff]   ;;  %v3604_v45 = vld [vmem:[#allocation2 + $0x324] ss:$16 sps:$4 sm:$0xff]  }
  0x53   :  { %1301 = vmatpush1.bf16.msra.mxu0 %v3522_v48  ;;  %1473 = vmatpush1.bf16.msra.mxu1 %v3523_v49  ;;  %v3605_v48 = vld [vmem:[#allocation2 + $0x328] ss:$16 sps:$4 sm:$0xff]   ;;  %v3610_v49 = vld [vmem:[#allocation2 + $0x344] ss:$16 sps:$4 sm:$0xff]  }
  0x54   :  { %1302 = vmatprep.subr.bf16.mxu0 %v3524_v51  ;;  %1474 = vmatprep.subr.bf16.mxu1 %v3526_v52  ;;  %v3608_v51 = vld [vmem:[#allocation2 + $0x340] ss:$16 sps:$4 sm:$0xff]   ;;  %v3611_v52 = vld [vmem:[#allocation2 + $0x348] ss:$16 sps:$4 sm:$0xff]  }
  0x57   :  { %1303 = vmatpush1.bf16.msra.mxu0 %v3528_v53  ;;  %1475 = vmatpush1.bf16.msra.mxu1 %v3529_v54  ;;  %v3616_v53 = vld [vmem:[#allocation2 + $0x364] ss:$16 sps:$4 sm:$0xff]   ;;  %v3619_v54 = vld [vmem:[#allocation2 + $0x36c] ss:$16 sps:$4 sm:$0xff]  }
  0x58   :  { %1304 = vmatprep.subr.bf16.mxu0 %v3530_v55  ;;  %1476 = vmatprep.subr.bf16.mxu1 %v3532_v56  ;;  %v3614_v55 = vld [vmem:[#allocation2 + $0x360] ss:$16 sps:$4 sm:$0xff]   ;;  %v3617_v56 = vld [vmem:[#allocation2 + $0x368] ss:$16 sps:$4 sm:$0xff]  }
  0x5b   :  { %1305 = vmatpush1.bf16.msra.mxu0 %v3534_v57  ;;  %1477 = vmatpush1.bf16.msra.mxu1 %v3535_v58  ;;  %v3622_v57 = vld [vmem:[#allocation2 + $0x384] ss:$16 sps:$4 sm:$0xff]   ;;  %v3625_v58 = vld [vmem:[#allocation2 + $0x38c] ss:$16 sps:$4 sm:$0xff]  }
  0x5c   :  { %1306 = vmatprep.subr.bf16.mxu0 %v3536_v59  ;;  %1478 = vmatprep.subr.bf16.mxu1 %v3538_v60  ;;  %v3620_v59 = vld [vmem:[#allocation2 + $0x380] ss:$16 sps:$4 sm:$0xff]   ;;  %v3623_v60 = vld [vmem:[#allocation2 + $0x388] ss:$16 sps:$4 sm:$0xff]  }
  0x5f   :  { %1307 = vmatpush1.bf16.msra.mxu0 %v3540_v61  ;;  %1479 = vmatpush1.bf16.msra.mxu1 %v3541_v62  ;;  %v3628_v61 = vld [vmem:[#allocation2 + $0x3a4] ss:$16 sps:$4 sm:$0xff]   ;;  %v3631_v62 = vld [vmem:[#allocation2 + $0x3ac] ss:$16 sps:$4 sm:$0xff]  }
  0x60   :  { %1308 = vmatprep.subr.bf16.mxu0 %v3542_v63  ;;  %1480 = vmatprep.subr.bf16.mxu1 %v3544_v0  ;;  %v3626_v63 = vld [vmem:[#allocation2 + $0x3a0] ss:$16 sps:$4 sm:$0xff]   ;;  %v3629_v0 = vld [vmem:[#allocation2 + $0x3a8] ss:$16 sps:$4 sm:$0xff]  }
  0x63   :  { %1309 = vmatpush1.bf16.msra.mxu0 %v3546_v1  ;;  %1481 = vmatpush1.bf16.msra.mxu1 %v3547_v2  ;;  %v3634_v1 = vld [vmem:[#allocation2 + $0x3c4] ss:$16 sps:$4 sm:$0xff]   ;;  %v3637_v2 = vld [vmem:[#allocation2 + $0x3cc] ss:$16 sps:$4 sm:$0xff]  }
  0x64   :  { %1321 = vmatprep.subr.bf16.mxu0 %v3550_v3  ;;  %1493 = vmatprep.subr.bf16.mxu1 %v3553_v6  ;;  %v3632_v3 = vld [vmem:[#allocation2 + $0x3c0] ss:$16 sps:$4 sm:$0xff]   ;;  %v3643_v6 = vld [vmem:[#allocation2 + $0x3ec] ss:$16 sps:$4 sm:$0xff]  }
  0x66   :  { %1311 = vmatmul.mubr.bf16.vlgmr.msra.gmra.mrb[0].mxu0 %v69_v9  ;;  %1483 = vmatmul.mubr.bf16.vlgmr.msra.gmra.mrb[0].mxu1 %v69_v9  ;;  %v3646_v9 = vld [vmem:[#allocation2 + $0x404] ss:$16 sps:$4 sm:$0xff]  }
  0x67   :  { %1322 = vmatpush1.bf16.msra.mxu0 %v3548_v7  ;;  %1494 = vmatpush1.bf16.msra.mxu1 %v3551_v8  ;;  %v3638_v7 = vld [vmem:[#allocation2 + $0x3e0] ss:$16 sps:$4 sm:$0xff]   ;;  %v3641_v8 = vld [vmem:[#allocation2 + $0x3e8] ss:$16 sps:$4 sm:$0xff]  }
  0x68   :  { %1323 = vmatprep.subr.bf16.mxu0 %v3556_v10  ;;  %1495 = vmatprep.subr.bf16.mxu1 %v3559_v11  ;;  %v57_v10 = vld [vmem:[%s4273_s0 + $0x10] sm:$0xff]  ;;  %v64_v11 = vld [vmem:[%s4273_s0 + $0x48] sm:$0xff] }
  0x69   :  { %1353 = vmatprep.mubr.bf16.mxu0 %v72_v36  ;;  %1525 = vmatprep.mubr.bf16.mxu1 %v72_v36  ;;  %v3679_v36 = vld [vmem:[#allocation2 + $0x4ac] ss:$16 sps:$4 sm:$0xff]  }
  0x6b   :  { %1324 = vmatpush1.bf16.msra.mxu0 %v3554_v12  ;;  %1496 = vmatpush1.bf16.msra.mxu1 %v3557_v13  ;;  %v3649_v12 = vld [vmem:[#allocation2 + $0x40c] ss:$16 sps:$4 sm:$0xff]   ;;  %v3644_v13 = vld [vmem:[#allocation2 + $0x400] ss:$16 sps:$4 sm:$0xff]  }
  0x6c   :  { %1325 = vmatprep.subr.bf16.mxu0 %v3562_v14  ;;  %1497 = vmatprep.subr.bf16.mxu1 %v3565_v15  ;;  %v3647_v14 = vld [vmem:[#allocation2 + $0x408] ss:$16 sps:$4 sm:$0xff]   ;;  %v71_v15 = vpack.c.bf16 %v64_v11, %v57_v10  ;;  %v3736_v11 = vld [vmem:[#allocation2 + $0x5e4] ss:$16 sps:$4 sm:$0xff]  }
  0x6d   :  { %v3731_v10 = vld [vmem:[#allocation2 + $0x5c8] ss:$16 sps:$4 sm:$0xff]  }
  0x6f   :  { %1326 = vmatpush1.bf16.msra.mxu0 %v3560_v16  ;;  %1498 = vmatpush1.bf16.msra.mxu1 %v3563_v17  ;;  %v3652_v16 = vld [vmem:[#allocation2 + $0x424] ss:$16 sps:$4 sm:$0xff]   ;;  %v3655_v17 = vld [vmem:[#allocation2 + $0x42c] ss:$16 sps:$4 sm:$0xff]  }
  0x70   :  { %1327 = vmatprep.subr.bf16.mxu0 %v3568_v18  ;;  %1499 = vmatprep.subr.bf16.mxu1 %v3571_v19  ;;  %v60_v18 = vld [vmem:[%s4273_s0 + $0x28] sm:$0xff]  ;;  %v3650_v19 = vld [vmem:[#allocation2 + $0x420] ss:$16 sps:$4 sm:$0xff]  }
  0x73   :  { %1328 = vmatpush1.bf16.msra.mxu0 %v3566_v20  ;;  %1500 = vmatpush1.bf16.msra.mxu1 %v3569_v21  ;;  %v3653_v20 = vld [vmem:[#allocation2 + $0x428] ss:$16 sps:$4 sm:$0xff]   ;;  %v67_v21 = vld [vmem:[%s4273_s0 + $0x60] sm:$0xff] }
  0x74   :  { %1329 = vmatprep.subr.bf16.mxu0 %v3574_v22  ;;  %1501 = vmatprep.subr.bf16.mxu1 %v3577_v23  ;;  %v3658_v22 = vld [vmem:[#allocation2 + $0x444] ss:$16 sps:$4 sm:$0xff]   ;;  %v74_v23 = vpack.c.bf16 %v67_v21, %v60_v18  ;;  %v3745_v18 = vld [vmem:[#allocation2 + $0x60c] ss:$16 sps:$4 sm:$0xff]  }
  0x77   :  { %1330 = vmatpush1.bf16.msra.mxu0 %v3572_v24  ;;  %1502 = vmatpush1.bf16.msra.mxu1 %v3575_v25  ;;  %v3661_v24 = vld [vmem:[#allocation2 + $0x44c] ss:$16 sps:$4 sm:$0xff]   ;;  %v3656_v25 = vld [vmem:[#allocation2 + $0x440] ss:$16 sps:$4 sm:$0xff]  }
  0x78   :  { %1331 = vmatprep.subr.bf16.mxu0 %v3580_v26  ;;  %1503 = vmatprep.subr.bf16.mxu1 %v3583_v27  ;;  %v3659_v26 = vld [vmem:[#allocation2 + $0x448] ss:$16 sps:$4 sm:$0xff]   ;;  %v3664_v27 = vld [vmem:[#allocation2 + $0x464] ss:$16 sps:$4 sm:$0xff]  }
  0x7b   :  { %1332 = vmatpush1.bf16.msra.mxu0 %v3578_v28  ;;  %1504 = vmatpush1.bf16.msra.mxu1 %v3581_v29  ;;  %v3667_v28 = vld [vmem:[#allocation2 + $0x46c] ss:$16 sps:$4 sm:$0xff]   ;;  %v3662_v29 = vld [vmem:[#allocation2 + $0x460] ss:$16 sps:$4 sm:$0xff]  }
  0x7c   :  { %1333 = vmatprep.subr.bf16.mxu0 %v3586_v30  ;;  %1505 = vmatprep.subr.bf16.mxu1 %v3589_v31  ;;  %v3665_v30 = vld [vmem:[#allocation2 + $0x468] ss:$16 sps:$4 sm:$0xff]   ;;  %v3670_v31 = vld [vmem:[#allocation2 + $0x484] ss:$16 sps:$4 sm:$0xff]  }
  0x7f   :  { %1334 = vmatpush1.bf16.msra.mxu0 %v3584_v34  ;;  %1506 = vmatpush1.bf16.msra.mxu1 %v3587_v35  ;;  %v3671_v34 = vld [vmem:[#allocation2 + $0x488] ss:$16 sps:$4 sm:$0xff]   ;;  %v3676_v35 = vld [vmem:[#allocation2 + $0x4a4] ss:$16 sps:$4 sm:$0xff]  }
  0x80   :  { %1335 = vmatprep.subr.bf16.mxu0 %v3592_v37  ;;  %1507 = vmatprep.subr.bf16.mxu1 %v3595_v38  ;;  %v3674_v37 = vld [vmem:[#allocation2 + $0x4a0] ss:$16 sps:$4 sm:$0xff]   ;;  %v3677_v38 = vld [vmem:[#allocation2 + $0x4a8] ss:$16 sps:$4 sm:$0xff]  }
  0x83   :  { %1336 = vmatpush1.bf16.msra.mxu0 %v3590_v39  ;;  %1508 = vmatpush1.bf16.msra.mxu1 %v3593_v40  ;;  %v3682_v39 = vld [vmem:[#allocation2 + $0x4c4] ss:$16 sps:$4 sm:$0xff]   ;;  %v3685_v40 = vld [vmem:[#allocation2 + $0x4cc] ss:$16 sps:$4 sm:$0xff]  }
  0x84   :  { %1337 = vmatprep.subr.bf16.mxu0 %v3598_v41  ;;  %1509 = vmatprep.subr.bf16.mxu1 %v3601_v42  ;;  %v3680_v41 = vld [vmem:[#allocation2 + $0x4c0] ss:$16 sps:$4 sm:$0xff]   ;;  %v3683_v42 = vld [vmem:[#allocation2 + $0x4c8] ss:$16 sps:$4 sm:$0xff]  }
  0x87   :  { %1338 = vmatpush1.bf16.msra.mxu0 %v3596_v43  ;;  %1510 = vmatpush1.bf16.msra.mxu1 %v3599_v44  ;;  %v3688_v43 = vld [vmem:[#allocation2 + $0x4e4] ss:$16 sps:$4 sm:$0xff]   ;;  %v3691_v44 = vld [vmem:[#allocation2 + $0x4ec] ss:$16 sps:$4 sm:$0xff]  }
  0x88   :  { %1339 = vmatprep.subr.bf16.mxu0 %v3604_v45  ;;  %1511 = vmatprep.subr.bf16.mxu1 %v3607_v46  ;;  %v3686_v45 = vld [vmem:[#allocation2 + $0x4e0] ss:$16 sps:$4 sm:$0xff]   ;;  %v3689_v46 = vld [vmem:[#allocation2 + $0x4e8] ss:$16 sps:$4 sm:$0xff]  }
  0x8b   :  { %1340 = vmatpush1.bf16.msra.mxu0 %v3602_v47  ;;  %1512 = vmatpush1.bf16.msra.mxu1 %v3605_v48  ;;  %v3694_v47 = vld [vmem:[#allocation2 + $0x504] ss:$16 sps:$4 sm:$0xff]   ;;  %v3697_v48 = vld [vmem:[#allocation2 + $0x50c] ss:$16 sps:$4 sm:$0xff]  }
  0x8c   :  { %1341 = vmatprep.subr.bf16.mxu0 %v3610_v49  ;;  %1513 = vmatprep.subr.bf16.mxu1 %v3613_v50  ;;  %v3692_v49 = vld [vmem:[#allocation2 + $0x500] ss:$16 sps:$4 sm:$0xff]   ;;  %v3695_v50 = vld [vmem:[#allocation2 + $0x508] ss:$16 sps:$4 sm:$0xff]  }
  0x8f   :  { %1342 = vmatpush1.bf16.msra.mxu0 %v3608_v51  ;;  %1514 = vmatpush1.bf16.msra.mxu1 %v3611_v52  ;;  %v3700_v51 = vld [vmem:[#allocation2 + $0x524] ss:$16 sps:$4 sm:$0xff]   ;;  %v3703_v52 = vld [vmem:[#allocation2 + $0x52c] ss:$16 sps:$4 sm:$0xff]  }
  0x90   :  { %1343 = vmatprep.subr.bf16.mxu0 %v3616_v53  ;;  %1515 = vmatprep.subr.bf16.mxu1 %v3619_v54  ;;  %v3698_v53 = vld [vmem:[#allocation2 + $0x520] ss:$16 sps:$4 sm:$0xff]   ;;  %v3701_v54 = vld [vmem:[#allocation2 + $0x528] ss:$16 sps:$4 sm:$0xff]  }
  0x93   :  { %1344 = vmatpush1.bf16.msra.mxu0 %v3614_v55  ;;  %1516 = vmatpush1.bf16.msra.mxu1 %v3617_v56  ;;  %v3706_v55 = vld [vmem:[#allocation2 + $0x544] ss:$16 sps:$4 sm:$0xff]   ;;  %v3709_v56 = vld [vmem:[#allocation2 + $0x54c] ss:$16 sps:$4 sm:$0xff]  }
  0x94   :  { %1345 = vmatprep.subr.bf16.mxu0 %v3622_v57  ;;  %1517 = vmatprep.subr.bf16.mxu1 %v3625_v58  ;;  %v3704_v57 = vld [vmem:[#allocation2 + $0x540] ss:$16 sps:$4 sm:$0xff]   ;;  %v3707_v58 = vld [vmem:[#allocation2 + $0x548] ss:$16 sps:$4 sm:$0xff]  }
  0x97   :  { %1346 = vmatpush1.bf16.msra.mxu0 %v3620_v59  ;;  %1518 = vmatpush1.bf16.msra.mxu1 %v3623_v60  ;;  %v3712_v59 = vld [vmem:[#allocation2 + $0x564] ss:$16 sps:$4 sm:$0xff]   ;;  %v3715_v60 = vld [vmem:[#allocation2 + $0x56c] ss:$16 sps:$4 sm:$0xff]  }
  0x98   :  { %1347 = vmatprep.subr.bf16.mxu0 %v3628_v61  ;;  %1519 = vmatprep.subr.bf16.mxu1 %v3631_v62  ;;  %v3710_v61 = vld [vmem:[#allocation2 + $0x560] ss:$16 sps:$4 sm:$0xff]   ;;  %v3713_v62 = vld [vmem:[#allocation2 + $0x568] ss:$16 sps:$4 sm:$0xff]  }
  0x9b   :  { %1348 = vmatpush1.bf16.msra.mxu0 %v3626_v63  ;;  %1520 = vmatpush1.bf16.msra.mxu1 %v3629_v0  ;;  %v3718_v63 = vld [vmem:[#allocation2 + $0x584] ss:$16 sps:$4 sm:$0xff]   ;;  %v3721_v0 = vld [vmem:[#allocation2 + $0x58c] ss:$16 sps:$4 sm:$0xff]  }
  0x9c   :  { %1349 = vmatprep.subr.bf16.mxu0 %v3634_v1  ;;  %1521 = vmatprep.subr.bf16.mxu1 %v3637_v2  ;;  %v3716_v1 = vld [vmem:[#allocation2 + $0x580] ss:$16 sps:$4 sm:$0xff]   ;;  %v3719_v2 = vld [vmem:[#allocation2 + $0x588] ss:$16 sps:$4 sm:$0xff]  }
  0x9f   :  { %1350 = vmatpush1.bf16.msra.mxu0 %v3632_v3  ;;  %1522 = vmatpush1.bf16.msra.mxu1 %v3635_v4  ;;  %v3724_v3 = vld [vmem:[#allocation2 + $0x5a4] ss:$16 sps:$4 sm:$0xff]   ;;  %v3727_v4 = vld [vmem:[#allocation2 + $0x5ac] ss:$16 sps:$4 sm:$0xff]  }
  0xa0   :  { %1351 = vmatprep.subr.bf16.mxu0 %v3640_v5  ;;  %1523 = vmatprep.subr.bf16.mxu1 %v3643_v6  ;;  %v3722_v5 = vld [vmem:[#allocation2 + $0x5a0] ss:$16 sps:$4 sm:$0xff]   ;;  %v3725_v6 = vld [vmem:[#allocation2 + $0x5a8] ss:$16 sps:$4 sm:$0xff]  }
  0xa3   :  { %1352 = vmatpush1.bf16.msra.mxu0 %v3638_v7  ;;  %1524 = vmatpush1.bf16.msra.mxu1 %v3641_v8  ;;  %v3730_v7 = vld [vmem:[#allocation2 + $0x5c4] ss:$16 sps:$4 sm:$0xff]   ;;  %v3733_v8 = vld [vmem:[#allocation2 + $0x5cc] ss:$16 sps:$4 sm:$0xff]  }
  0xa4   :  { %1364 = vmatprep.subr.bf16.mxu0 %v3646_v9  ;;  %1536 = vmatprep.subr.bf16.mxu1 %v3649_v12  ;;  %v3728_v9 = vld [vmem:[#allocation2 + $0x5c0] ss:$16 sps:$4 sm:$0xff]   ;;  %v3739_v12 = vld [vmem:[#allocation2 + $0x5ec] ss:$16 sps:$4 sm:$0xff]  }
  0xa6   :  { %1354 = vmatmul.mubr.bf16.vlgmr.msra.gmra.mrb[0].mxu0 %v71_v15  ;;  %1526 = vmatmul.mubr.bf16.vlgmr.msra.gmra.mrb[0].mxu1 %v71_v15  ;;  %v59_v15 = vld [vmem:[%s4273_s0 + $0x20] sm:$0xff] }
  0xa7   :  { %1365 = vmatpush1.bf16.msra.mxu0 %v3644_v13  ;;  %1537 = vmatpush1.bf16.msra.mxu1 %v3647_v14  ;;  %v3734_v13 = vld [vmem:[#allocation2 + $0x5e0] ss:$16 sps:$4 sm:$0xff]   ;;  %v3737_v14 = vld [vmem:[#allocation2 + $0x5e8] ss:$16 sps:$4 sm:$0xff]  }
  0xa8   :  { %1366 = vmatprep.subr.bf16.mxu0 %v3652_v16  ;;  %1538 = vmatprep.subr.bf16.mxu1 %v3655_v17  ;;  %v66_v16 = vld [vmem:[%s4273_s0 + $0x58] sm:$0xff]  ;;  %v3742_v17 = vld [vmem:[#allocation2 + $0x604] ss:$16 sps:$4 sm:$0xff]  }
  0xa9   :  { %1396 = vmatprep.mubr.bf16.mxu0 %v74_v23  ;;  %1568 = vmatprep.mubr.bf16.mxu1 %v74_v23  ;;  %v73_v21 = vpack.c.bf16 %v66_v16, %v59_v15  ;;  %v3751_v23 = vld [vmem:[#allocation4 + $0xc] ss:$16 sps:$4 sm:$0xff]   ;;  %v3824_v16 = vld [vmem:[#allocation4 + $0x1a0] ss:$16 sps:$4 sm:$0xff]  }
  0xaa   :  { %v3829_v15 = vld [vmem:[#allocation4 + $0x1ac] ss:$16 sps:$4 sm:$0xff]  }
  0xab   :  { %1367 = vmatpush1.bf16.msra.mxu0 %v3650_v19  ;;  %1539 = vmatpush1.bf16.msra.mxu1 %v3653_v20  ;;  %v3740_v19 = vld [vmem:[#allocation2 + $0x600] ss:$16 sps:$4 sm:$0xff]   ;;  %v3743_v20 = vld [vmem:[#allocation2 + $0x608] ss:$16 sps:$4 sm:$0xff]  }
  0xac   :  { %1368 = vmatprep.subr.bf16.mxu0 %v3658_v22  ;;  %1540 = vmatprep.subr.bf16.mxu1 %v3661_v24  ;;  %v3748_v22 = vld [vmem:[#allocation4 + $0x4] ss:$16 sps:$4 sm:$0xff]   ;;  %v4030_v24 = vmov 0  }
  0xaf   :  { %1369 = vmatpush1.bf16.msra.mxu0 %v3656_v25  ;;  %1541 = vmatpush1.bf16.msra.mxu1 %v3659_v26  ;;  %v61_v25 = vld [vmem:[%s4273_s0 + $0x30] sm:$0xff]  ;;  %v68_v26 = vld [vmem:[%s4273_s0 + $0x68] sm:$0xff] }
  0xb0   :  { %1370 = vmatprep.subr.bf16.mxu0 %v3664_v27  ;;  %1542 = vmatprep.subr.bf16.mxu1 %v3667_v28  ;;  %v3746_v27 = vld [vmem:[#allocation4] ss:$16 sps:$4 sm:$0xff]   ;;  %v3749_v28 = vld [vmem:[#allocation4 + $0x8] ss:$16 sps:$4 sm:$0xff]  }
  0xb3   :  { %1371 = vmatpush1.bf16.msra.mxu0 %v3662_v29  ;;  %1543 = vmatpush1.bf16.msra.mxu1 %v3665_v30  ;;  %v75_v29 = vpack.c.bf16 %v68_v26, %v61_v25  ;;  %v3754_v30 = vld [vmem:[#allocation4 + $0x24] ss:$16 sps:$4 sm:$0xff]   ;;  %v3839_v25 = vld [vmem:[#allocation4 + $0x1e8] ss:$16 sps:$4 sm:$0xff]  }
  0xb4   :  { %1372 = vmatprep.subr.bf16.mxu0 %v3670_v31  ;;  %1544 = vmatprep.subr.bf16.mxu1 %v3673_v32  ;;  %v3757_v31 = vld [vmem:[#allocation4 + $0x2c] ss:$16 sps:$4 sm:$0xff]   ;;  %v3752_v32 = vld [vmem:[#allocation4 + $0x20] ss:$16 sps:$4 sm:$0xff]   ;;  %v3844_v26 = vld [vmem:[#allocation4 + $0x204] ss:$16 sps:$4 sm:$0xff]  }
  0xb7   :  { %1373 = vmatpush1.bf16.msra.mxu0 %v3668_v33  ;;  %1545 = vmatpush1.bf16.msra.mxu1 %v3671_v34  ;;  %v3755_v33 = vld [vmem:[#allocation4 + $0x28] ss:$16 sps:$4 sm:$0xff]   ;;  %v3760_v34 = vld [vmem:[#allocation4 + $0x44] ss:$16 sps:$4 sm:$0xff]  }
  0xb8   :  { %1374 = vmatprep.subr.bf16.mxu0 %v3676_v35  ;;  %1546 = vmatprep.subr.bf16.mxu1 %v3679_v36  ;;  %v3763_v35 = vld [vmem:[#allocation4 + $0x4c] ss:$16 sps:$4 sm:$0xff]   ;;  %v3758_v36 = vld [vmem:[#allocation4 + $0x40] ss:$16 sps:$4 sm:$0xff]  }
  0xbb   :  { %1375 = vmatpush1.bf16.msra.mxu0 %v3674_v37  ;;  %1547 = vmatpush1.bf16.msra.mxu1 %v3677_v38  ;;  %v3761_v37 = vld [vmem:[#allocation4 + $0x48] ss:$16 sps:$4 sm:$0xff]   ;;  %v3766_v38 = vld [vmem:[#allocation4 + $0x64] ss:$16 sps:$4 sm:$0xff]  }
  0xbc   :  { %1376 = vmatprep.subr.bf16.mxu0 %v3682_v39  ;;  %1548 = vmatprep.subr.bf16.mxu1 %v3685_v40  ;;  %v3769_v39 = vld [vmem:[#allocation4 + $0x6c] ss:$16 sps:$4 sm:$0xff]   ;;  %v3764_v40 = vld [vmem:[#allocation4 + $0x60] ss:$16 sps:$4 sm:$0xff]  }
  0xbf   :  { %1377 = vmatpush1.bf16.msra.mxu0 %v3680_v41  ;;  %1549 = vmatpush1.bf16.msra.mxu1 %v3683_v42  ;;  %v3767_v41 = vld [vmem:[#allocation4 + $0x68] ss:$16 sps:$4 sm:$0xff]   ;;  %v3772_v42 = vld [vmem:[#allocation4 + $0x84] ss:$16 sps:$4 sm:$0xff]  }
  0xc0   :  { %1378 = vmatprep.subr.bf16.mxu0 %v3688_v43  ;;  %1550 = vmatprep.subr.bf16.mxu1 %v3691_v44  ;;  %v3775_v43 = vld [vmem:[#allocation4 + $0x8c] ss:$16 sps:$4 sm:$0xff]   ;;  %v3770_v44 = vld [vmem:[#allocation4 + $0x80] ss:$16 sps:$4 sm:$0xff]  }
  0xc3   :  { %1379 = vmatpush1.bf16.msra.mxu0 %v3686_v45  ;;  %1551 = vmatpush1.bf16.msra.mxu1 %v3689_v46  ;;  %v3773_v45 = vld [vmem:[#allocation4 + $0x88] ss:$16 sps:$4 sm:$0xff]   ;;  %v3778_v46 = vld [vmem:[#allocation4 + $0xa4] ss:$16 sps:$4 sm:$0xff]  }
  0xc4   :  { %1380 = vmatprep.subr.bf16.mxu0 %v3694_v47  ;;  %1552 = vmatprep.subr.bf16.mxu1 %v3697_v48  ;;  %v3781_v47 = vld [vmem:[#allocation4 + $0xac] ss:$16 sps:$4 sm:$0xff]   ;;  %v3776_v48 = vld [vmem:[#allocation4 + $0xa0] ss:$16 sps:$4 sm:$0xff]  }
  0xc7   :  { %1381 = vmatpush1.bf16.msra.mxu0 %v3692_v49  ;;  %1553 = vmatpush1.bf16.msra.mxu1 %v3695_v50  ;;  %v3779_v49 = vld [vmem:[#allocation4 + $0xa8] ss:$16 sps:$4 sm:$0xff]   ;;  %v3784_v50 = vld [vmem:[#allocation4 + $0xc4] ss:$16 sps:$4 sm:$0xff]  }
  0xc8   :  { %1382 = vmatprep.subr.bf16.mxu0 %v3700_v51  ;;  %1554 = vmatprep.subr.bf16.mxu1 %v3703_v52  ;;  %v3787_v51 = vld [vmem:[#allocation4 + $0xcc] ss:$16 sps:$4 sm:$0xff]   ;;  %v3782_v52 = vld [vmem:[#allocation4 + $0xc0] ss:$16 sps:$4 sm:$0xff]  }
  0xcb   :  { %1383 = vmatpush1.bf16.msra.mxu0 %v3698_v53  ;;  %1555 = vmatpush1.bf16.msra.mxu1 %v3701_v54  ;;  %v3785_v53 = vld [vmem:[#allocation4 + $0xc8] ss:$16 sps:$4 sm:$0xff]   ;;  %v3790_v54 = vld [vmem:[#allocation4 + $0xe4] ss:$16 sps:$4 sm:$0xff]  }
  0xcc   :  { %1384 = vmatprep.subr.bf16.mxu0 %v3706_v55  ;;  %1556 = vmatprep.subr.bf16.mxu1 %v3709_v56  ;;  %v3793_v55 = vld [vmem:[#allocation4 + $0xec] ss:$16 sps:$4 sm:$0xff]   ;;  %v3788_v56 = vld [vmem:[#allocation4 + $0xe0] ss:$16 sps:$4 sm:$0xff]  }
  0xcf   :  { %1385 = vmatpush1.bf16.msra.mxu0 %v3704_v57  ;;  %1557 = vmatpush1.bf16.msra.mxu1 %v3707_v58  ;;  %v3791_v57 = vld [vmem:[#allocation4 + $0xe8] ss:$16 sps:$4 sm:$0xff]   ;;  %v3796_v58 = vld [vmem:[#allocation4 + $0x104] ss:$16 sps:$4 sm:$0xff]  }
  0xd0   :  { %1386 = vmatprep.subr.bf16.mxu0 %v3712_v59  ;;  %1558 = vmatprep.subr.bf16.mxu1 %v3715_v60  ;;  %v3799_v59 = vld [vmem:[#allocation4 + $0x10c] ss:$16 sps:$4 sm:$0xff]   ;;  %v3794_v60 = vld [vmem:[#allocation4 + $0x100] ss:$16 sps:$4 sm:$0xff]  }
  0xd3   :  { %1387 = vmatpush1.bf16.msra.mxu0 %v3710_v61  ;;  %1559 = vmatpush1.bf16.msra.mxu1 %v3713_v62  ;;  %v3797_v61 = vld [vmem:[#allocation4 + $0x108] ss:$16 sps:$4 sm:$0xff]   ;;  %v3802_v62 = vld [vmem:[#allocation4 + $0x124] ss:$16 sps:$4 sm:$0xff]  }
  0xd4   :  { %1388 = vmatprep.subr.bf16.mxu0 %v3718_v63  ;;  %1560 = vmatprep.subr.bf16.mxu1 %v3721_v0  ;;  %v3805_v63 = vld [vmem:[#allocation4 + $0x12c] ss:$16 sps:$4 sm:$0xff]   ;;  %v3800_v0 = vld [vmem:[#allocation4 + $0x120] ss:$16 sps:$4 sm:$0xff]  }
  0xd7   :  { %1389 = vmatpush1.bf16.msra.mxu0 %v3716_v1  ;;  %1561 = vmatpush1.bf16.msra.mxu1 %v3719_v2  ;;  %v3803_v1 = vld [vmem:[#allocation4 + $0x128] ss:$16 sps:$4 sm:$0xff]   ;;  %v3808_v2 = vld [vmem:[#allocation4 + $0x144] ss:$16 sps:$4 sm:$0xff]  }
  0xd8   :  { %1390 = vmatprep.subr.bf16.mxu0 %v3724_v3  ;;  %1562 = vmatprep.subr.bf16.mxu1 %v3727_v4  ;;  %v3811_v3 = vld [vmem:[#allocation4 + $0x14c] ss:$16 sps:$4 sm:$0xff]   ;;  %v3806_v4 = vld [vmem:[#allocation4 + $0x140] ss:$16 sps:$4 sm:$0xff]  }
  0xdb   :  { %1391 = vmatpush1.bf16.msra.mxu0 %v3722_v5  ;;  %1563 = vmatpush1.bf16.msra.mxu1 %v3725_v6  ;;  %v3809_v5 = vld [vmem:[#allocation4 + $0x148] ss:$16 sps:$4 sm:$0xff]   ;;  %v3814_v6 = vld [vmem:[#allocation4 + $0x164] ss:$16 sps:$4 sm:$0xff]  }
  0xdc   :  { %1392 = vmatprep.subr.bf16.mxu0 %v3730_v7  ;;  %1564 = vmatprep.subr.bf16.mxu1 %v3733_v8  ;;  %v3817_v7 = vld [vmem:[#allocation4 + $0x16c] ss:$16 sps:$4 sm:$0xff]   ;;  %v3812_v8 = vld [vmem:[#allocation4 + $0x160] ss:$16 sps:$4 sm:$0xff]  }
  0xdf   :  { %1393 = vmatpush1.bf16.msra.mxu0 %v3728_v9  ;;  %1565 = vmatpush1.bf16.msra.mxu1 %v3731_v10  ;;  %v3815_v9 = vld [vmem:[#allocation4 + $0x168] ss:$16 sps:$4 sm:$0xff]   ;;  %v3820_v10 = vld [vmem:[#allocation4 + $0x184] ss:$16 sps:$4 sm:$0xff]  }
  0xe0   :  { %1394 = vmatprep.subr.bf16.mxu0 %v3736_v11  ;;  %1566 = vmatprep.subr.bf16.mxu1 %v3739_v12  ;;  %v3823_v11 = vld [vmem:[#allocation4 + $0x18c] ss:$16 sps:$4 sm:$0xff]   ;;  %v3818_v12 = vld [vmem:[#allocation4 + $0x180] ss:$16 sps:$4 sm:$0xff]  }
  0xe3   :  { %1395 = vmatpush1.bf16.msra.mxu0 %v3734_v13  ;;  %1567 = vmatpush1.bf16.msra.mxu1 %v3737_v14  ;;  %v3821_v13 = vld [vmem:[#allocation4 + $0x188] ss:$16 sps:$4 sm:$0xff]   ;;  %v3826_v14 = vld [vmem:[#allocation4 + $0x1a4] ss:$16 sps:$4 sm:$0xff]  }
  0xe4   :  { %1407 = vmatprep.subr.bf16.mxu0 %v3742_v17  ;;  %1579 = vmatprep.subr.bf16.mxu1 %v3745_v18  ;;  %v3827_v17 = vld [vmem:[#allocation4 + $0x1a8] ss:$16 sps:$4 sm:$0xff]   ;;  %v3832_v18 = vld [vmem:[#allocation4 + $0x1c4] ss:$16 sps:$4 sm:$0xff]  }
  0xe6   :  { %1397 = vmatmul.mubr.bf16.vlgmr.msra.gmra.mrb[0].mxu0 %v73_v21  ;;  %1569 = vmatmul.mubr.bf16.vlgmr.msra.gmra.mrb[0].mxu1 %v73_v21  ;;  %v3833_v21 = vld [vmem:[#allocation4 + $0x1c8] ss:$16 sps:$4 sm:$0xff]  }
  0xe7   :  { %1408 = vmatpush1.bf16.msra.mxu0 %v3740_v19  ;;  %1580 = vmatpush1.bf16.msra.mxu1 %v3743_v20  ;;  %v3835_v19 = vld [vmem:[#allocation4 + $0x1cc] ss:$16 sps:$4 sm:$0xff]   ;;  %v3830_v20 = vld [vmem:[#allocation4 + $0x1c0] ss:$16 sps:$4 sm:$0xff]  }
  0xe8   :  { %1439 = vmatprep.mubr.bf16.mxu0 %v4030_v24  ;;  %1611 = vmatprep.mubr.bf16.mxu1 %v4030_v24  ;;  %v3836_v24 = vld [vmem:[#allocation4 + $0x1e0] ss:$16 sps:$4 sm:$0xff]  }
  0xe9   :  { %2424 = vmatprep.subr.bf16.mxu0 %v3748_v22  ;;  %2510 = vmatprep.subr.bf16.mxu1 %v3751_v23  ;;  %v3838_v22 = vld [vmem:[#allocation4 + $0x1e4] ss:$16 sps:$4 sm:$0xff]   ;;  %v3841_v23 = vld [vmem:[#allocation4 + $0x1ec] ss:$16 sps:$4 sm:$0xff]  }
  0xf2   :  { %3183 = vmatmul.mubr.msk.bf16.vlgmr.msra.gmra.mrb[0].mxu0 %vm1274_vm0, %v75_v29  ;;  %3184 = vmatmul.mubr.msk.bf16.vlgmr.msra.gmra.mrb[0].mxu1 %vm1274_vm0, %v75_v29 }
  0xf3   :  { %2425 = vmatpush1.bf16.msra.mxu0 %v3746_v27  ;;  %2511 = vmatpush1.bf16.msra.mxu1 %v3749_v28  ;;  %v3847_v27 = vld [vmem:[#allocation4 + $0x20c] ss:$16 sps:$4 sm:$0xff]   ;;  %v274_v28 = vlaneseq }
  0xf4   :  { %2426 = vmatprep.subr.bf16.mxu0 %v3754_v30  ;;  %2512 = vmatprep.subr.bf16.mxu1 %v3757_v31 }
  0xf5   :  { %v4139_v29 = vshrl.u32 %v274_v28, 7  ;;  %v3881_v28 = vld [vmem:[#allocation4 + $0x2c8] ss:$16 sps:$4 sm:$0xff]  }
  0xf7   :  { %2427 = vmatpush1.bf16.msra.mxu0 %v3752_v32  ;;  %2513 = vmatpush1.bf16.msra.mxu1 %v3755_v33  ;;  %v276_v30 = vsub.s32 0, %v4139_v29  ;;  %v284_v31 = vsub.s32 2, %v4139_v29  ;;  %v272_v32 = vld [vmem:[%s4275_s2] sm:$0xf]  ;;  %v280_v33 = vsub.s32 1, %v4139_v29 }
  0xf8   :  { %2428 = vmatprep.subr.bf16.mxu0 %v3760_v34  ;;  %2514 = vmatprep.subr.bf16.mxu1 %v3763_v35  ;;  %v288_v34 = vsub.s32 3, %v4139_v29 }
  0xf9   :  { %v277_v35 = vrot.slane %v272_v32, %v276_v30 }
  0xfb   :  { %2429 = vmatpush1.bf16.msra.mxu0 %v3758_v36  ;;  %2515 = vmatpush1.bf16.msra.mxu1 %v3761_v37  ;;  %v285_v36 = vrot.slane %v272_v32, %v284_v31  ;;  %v281_v37 = vrot.slane %v272_v32, %v280_v33 }
  0xfc   :  { %2430 = vmatprep.subr.bf16.mxu0 %v3766_v38  ;;  %2516 = vmatprep.subr.bf16.mxu1 %v3769_v39  ;;  %v289_v38 = vrot.slane %v272_v32, %v288_v34  ;;  %v3886_v32 = vld [vmem:[#allocation4 + $0x2e4] ss:$16 sps:$4 sm:$0xff]  }
  0xff   :  { %2431 = vmatpush1.bf16.msra.mxu0 %v3764_v40  ;;  %2517 = vmatpush1.bf16.msra.mxu1 %v3767_v41 }
 0x100   :  { %2432 = vmatprep.subr.bf16.mxu0 %v3772_v42  ;;  %2518 = vmatprep.subr.bf16.mxu1 %v3775_v43 }
 0x103   :  { %2433 = vmatpush1.bf16.msra.mxu0 %v3770_v44  ;;  %2519 = vmatpush1.bf16.msra.mxu1 %v3773_v45 }
 0x104   :  { %2434 = vmatprep.subr.bf16.mxu0 %v3778_v46  ;;  %2520 = vmatprep.subr.bf16.mxu1 %v3781_v47 }
 0x107   :  { %2435 = vmatpush1.bf16.msra.mxu0 %v3776_v48  ;;  %2521 = vmatpush1.bf16.msra.mxu1 %v3779_v49 }
 0x108   :  { %2436 = vmatprep.subr.bf16.mxu0 %v3784_v50  ;;  %2522 = vmatprep.subr.bf16.mxu1 %v3787_v51 }
 0x10b   :  { %2437 = vmatpush1.bf16.msra.mxu0 %v3782_v52  ;;  %2523 = vmatpush1.bf16.msra.mxu1 %v3785_v53 }
 0x10c   :  { %2438 = vmatprep.subr.bf16.mxu0 %v3790_v54  ;;  %2524 = vmatprep.subr.bf16.mxu1 %v3793_v55 }
 0x10f   :  { %2439 = vmatpush1.bf16.msra.mxu0 %v3788_v56  ;;  %2525 = vmatpush1.bf16.msra.mxu1 %v3791_v57 }
 0x110   :  { %2440 = vmatprep.subr.bf16.mxu0 %v3796_v58  ;;  %2526 = vmatprep.subr.bf16.mxu1 %v3799_v59 }
 0x113   :  { %2441 = vmatpush1.bf16.msra.mxu0 %v3794_v60  ;;  %2527 = vmatpush1.bf16.msra.mxu1 %v3797_v61 }
 0x114   :  { %2442 = vmatprep.subr.bf16.mxu0 %v3802_v62  ;;  %2528 = vmatprep.subr.bf16.mxu1 %v3805_v63 }
 0x117   :  { %2443 = vmatpush1.bf16.msra.mxu0 %v3800_v0  ;;  %2529 = vmatpush1.bf16.msra.mxu1 %v3803_v1 }
 0x118   :  { %2444 = vmatprep.subr.bf16.mxu0 %v3808_v2  ;;  %2530 = vmatprep.subr.bf16.mxu1 %v3811_v3  ;;  %v3842_v3 = vld [vmem:[#allocation4 + $0x200] ss:$16 sps:$4 sm:$0xff]  }
 0x11b   :  { %2445 = vmatpush1.bf16.msra.mxu0 %v3806_v4  ;;  %2531 = vmatpush1.bf16.msra.mxu1 %v3809_v5  ;;  %v3845_v4 = vld [vmem:[#allocation4 + $0x208] ss:$16 sps:$4 sm:$0xff]   ;;  %v3850_v5 = vld [vmem:[#allocation4 + $0x224] ss:$16 sps:$4 sm:$0xff]  }
 0x11c   :  { %2446 = vmatprep.subr.bf16.mxu0 %v3814_v6  ;;  %2532 = vmatprep.subr.bf16.mxu1 %v3817_v7  ;;  %v3853_v6 = vld [vmem:[#allocation4 + $0x22c] ss:$16 sps:$4 sm:$0xff]   ;;  %v3848_v7 = vld [vmem:[#allocation4 + $0x220] ss:$16 sps:$4 sm:$0xff]  }
 0x11f   :  { %2447 = vmatpush1.bf16.msra.mxu0 %v3812_v8  ;;  %2533 = vmatpush1.bf16.msra.mxu1 %v3815_v9  ;;  %v3851_v8 = vld [vmem:[#allocation4 + $0x228] ss:$16 sps:$4 sm:$0xff]   ;;  %v3856_v9 = vld [vmem:[#allocation4 + $0x244] ss:$16 sps:$4 sm:$0xff]  }
 0x120   :  { %2448 = vmatprep.subr.bf16.mxu0 %v3820_v10  ;;  %2534 = vmatprep.subr.bf16.mxu1 %v3823_v11  ;;  %v3859_v10 = vld [vmem:[#allocation4 + $0x24c] ss:$16 sps:$4 sm:$0xff]   ;;  %v3854_v11 = vld [vmem:[#allocation4 + $0x240] ss:$16 sps:$4 sm:$0xff]  }
 0x123   :  { %2449 = vmatpush1.bf16.msra.mxu0 %v3818_v12  ;;  %2535 = vmatpush1.bf16.msra.mxu1 %v3821_v13  ;;  %v3857_v12 = vld [vmem:[#allocation4 + $0x248] ss:$16 sps:$4 sm:$0xff]   ;;  %v3862_v13 = vld [vmem:[#allocation4 + $0x264] ss:$16 sps:$4 sm:$0xff]  }
 0x124   :  { %2450 = vmatprep.subr.bf16.mxu0 %v3826_v14  ;;  %2536 = vmatprep.subr.bf16.mxu1 %v3829_v15  ;;  %v3865_v14 = vld [vmem:[#allocation4 + $0x26c] ss:$16 sps:$4 sm:$0xff]   ;;  %v3860_v15 = vld [vmem:[#allocation4 + $0x260] ss:$16 sps:$4 sm:$0xff]  }
 0x127   :  { %2451 = vmatpush1.bf16.msra.mxu0 %v3824_v16  ;;  %2537 = vmatpush1.bf16.msra.mxu1 %v3827_v17  ;;  %v3863_v16 = vld [vmem:[#allocation4 + $0x268] ss:$16 sps:$4 sm:$0xff]   ;;  %v3868_v17 = vld [vmem:[#allocation4 + $0x284] ss:$16 sps:$4 sm:$0xff]  }
 0x128   :  { %2452 = vmatprep.subr.bf16.mxu0 %v3832_v18  ;;  %2538 = vmatprep.subr.bf16.mxu1 %v3835_v19  ;;  %v3871_v18 = vld [vmem:[#allocation4 + $0x28c] ss:$16 sps:$4 sm:$0xff]   ;;  %v3866_v19 = vld [vmem:[#allocation4 + $0x280] ss:$16 sps:$4 sm:$0xff]  }
 0x12b   :  { %2453 = vmatpush1.bf16.msra.mxu0 %v3830_v20  ;;  %2539 = vmatpush1.bf16.msra.mxu1 %v3833_v21  ;;  %v3869_v20 = vld [vmem:[#allocation4 + $0x288] ss:$16 sps:$4 sm:$0xff]   ;;  %v3874_v21 = vld [vmem:[#allocation4 + $0x2a4] ss:$16 sps:$4 sm:$0xff]  }
 0x12c   :  { %2454 = vmatprep.subr.bf16.mxu0 %v3838_v22  ;;  %2540 = vmatprep.subr.bf16.mxu1 %v3841_v23  ;;  %v3877_v22 = vld [vmem:[#allocation4 + $0x2ac] ss:$16 sps:$4 sm:$0xff]   ;;  %v3872_v23 = vld [vmem:[#allocation4 + $0x2a0] ss:$16 sps:$4 sm:$0xff]  }
 0x12f   :  { %2455 = vmatpush1.bf16.msra.mxu0 %v3836_v24  ;;  %2541 = vmatpush1.bf16.msra.mxu1 %v3839_v25  ;;  %v3875_v24 = vld [vmem:[#allocation4 + $0x2a8] ss:$16 sps:$4 sm:$0xff]   ;;  %v3880_v25 = vld [vmem:[#allocation4 + $0x2c4] ss:$16 sps:$4 sm:$0xff]  }
 0x130   :  { %2467 = vmatprep.subr.bf16.mxu0 %v3844_v26  ;;  %2553 = vmatprep.subr.bf16.mxu1 %v3847_v27  ;;  %v3883_v26 = vld [vmem:[#allocation4 + $0x2cc] ss:$16 sps:$4 sm:$0xff]   ;;  %v3878_v27 = vld [vmem:[#allocation4 + $0x2c0] ss:$16 sps:$4 sm:$0xff]  }
 0x1c5   :  { %v1441_v39 = vpop.f32.mrb[0].mxu0  ;;  %v1613_v40 = vpop.f32.mrb[0].mxu1 }
 0x1c6   :  { %v3399_v41 = vadd.f32 %v1441_v39, %v277_v35  ;;  %v3403_v42 = vadd.f32 %v1613_v40, %v285_v36  ;;  %v1443_v43 = vpop.f32.mrb[1].mxu0  ;;  %v1615_v44 = vpop.f32.mrb[1].mxu1  ;;  %v3895_v39 = vld [vmem:[#allocation4 + $0x30c] ss:$16 sps:$4 sm:$0xff]   ;;  %v3890_v40 = vld [vmem:[#allocation4 + $0x300] ss:$16 sps:$4 sm:$0xff]  }
 0x1c7   :  { %v3400_v45 = vadd.f32 %v1443_v43, %v281_v37  ;;  %v3404_v46 = vadd.f32 %v1615_v44, %v289_v38  ;;  %v1445_v47 = vpop.f32.mrb[2].mxu0  ;;  %v1617_v48 = vpop.f32.mrb[2].mxu1  ;;  %v3901_v43 = vld [vmem:[#allocation4 + $0x32c] ss:$16 sps:$4 sm:$0xff]   ;;  %v3896_v44 = vld [vmem:[#allocation4 + $0x320] ss:$16 sps:$4 sm:$0xff]  }
 0x1c8   :  { %v3401_v49 = vadd.f32 %v1445_v47, %v277_v35  ;;  %v3405_v50 = vadd.f32 %v1617_v48, %v285_v36  ;;  %v1447_v51 = vpop.f32.mrb[3].mxu0  ;;  %v1619_v52 = vpop.f32.mrb[3].mxu1  ;;  %v1622_v55 = vmax.f32 %v3399_v41, 0.0  ;;  %v1624_v56 = vmax.f32 %v3403_v42, 0.0  ;;  %v3889_v35 = vld [vmem:[#allocation4 + $0x2ec] ss:$16 sps:$4 sm:$0xff]  }
 0x1c9   :  { %v3402_v53 = vadd.f32 %v1447_v51, %v281_v37  ;;  %v3406_v54 = vadd.f32 %v1619_v52, %v289_v38  ;;  %v1623_v59 = vmax.f32 %v3400_v45, 0.0  ;;  %v1625_v60 = vmax.f32 %v3404_v46, 0.0  ;;  %v3884_v36 = vld [vmem:[#allocation4 + $0x2e0] ss:$16 sps:$4 sm:$0xff]   ;;  %v3887_v37 = vld [vmem:[#allocation4 + $0x2e8] ss:$16 sps:$4 sm:$0xff]  }
 0x1ca   :  { %v1626_v57 = vmax.f32 %v3401_v49, 0.0  ;;  %v1628_v58 = vmax.f32 %v3405_v50, 0.0  ;;  %v3892_v38 = vld [vmem:[#allocation4 + $0x304] ss:$16 sps:$4 sm:$0xff]   ;;  %v3893_v41 = vld [vmem:[#allocation4 + $0x308] ss:$16 sps:$4 sm:$0xff]  }
 0x1cb   :  { %v1627_v61 = vmax.f32 %v3402_v53, 0.0  ;;  %v1629_v62 = vmax.f32 %v3406_v54, 0.0  ;;  %v3898_v42 = vld [vmem:[#allocation4 + $0x324] ss:$16 sps:$4 sm:$0xff]   ;;  %v3899_v45 = vld [vmem:[#allocation4 + $0x328] ss:$16 sps:$4 sm:$0xff]  }
 0x1cc   :  { %v1630_v63 = vpack.c.bf16 %v1626_v57, %v1622_v55  ;;  %v4156_v0 = vpack.c.bf16 %v1628_v58, %v1624_v56  ;;  %v3904_v46 = vld [vmem:[#allocation4 + $0x344] ss:$16 sps:$4 sm:$0xff]   ;;  %v3907_v47 = vld [vmem:[#allocation4 + $0x34c] ss:$16 sps:$4 sm:$0xff]   ;;  %v3902_v48 = vld [vmem:[#allocation4 + $0x340] ss:$16 sps:$4 sm:$0xff]  }
 0x1cd   :  { %v1631_v1 = vpack.c.bf16 %v1627_v61, %v1623_v59  ;;  %v1633_v2 = vpack.c.bf16 %v1629_v62, %v1625_v60  ;;  %v3905_v49 = vld [vmem:[#allocation4 + $0x348] ss:$16 sps:$4 sm:$0xff]   ;;  %v3910_v50 = vld [vmem:[#allocation4 + $0x364] ss:$16 sps:$4 sm:$0xff]   ;;  %v3913_v51 = vld [vmem:[#allocation4 + $0x36c] ss:$16 sps:$4 sm:$0xff]  }
 0x1ce   :  { %v3908_v52 = vld [vmem:[#allocation4 + $0x360] ss:$16 sps:$4 sm:$0xff]   ;;  %v3911_v53 = vld [vmem:[#allocation4 + $0x368] ss:$16 sps:$4 sm:$0xff]   ;;  %v3916_v54 = vld [vmem:[#allocation4 + $0x384] ss:$16 sps:$4 sm:$0xff]  }
 0x1cf   :  { %2456 = vmatprep.mubr.bf16.mxu0 %v1631_v1  ;;  %2542 = vmatprep.mubr.bf16.mxu1 %v1631_v1  ;;  %v3919_v55 = vld [vmem:[#allocation4 + $0x38c] ss:$16 sps:$4 sm:$0xff]   ;;  %v3914_v56 = vld [vmem:[#allocation4 + $0x380] ss:$16 sps:$4 sm:$0xff]   ;;  %v3917_v57 = vld [vmem:[#allocation4 + $0x388] ss:$16 sps:$4 sm:$0xff]  }
 0x1d0   :  { %2457 = vmatmul.mubr.bf16.vlgmr.msra.gmra.mrb[4].mxu0 %v1630_v63  ;;  %2543 = vmatmul.mubr.bf16.vlgmr.msra.gmra.mrb[4].mxu1 %v1630_v63  ;;  %v3922_v58 = vld [vmem:[#allocation4 + $0x3a4] ss:$16 sps:$4 sm:$0xff]   ;;  %v3925_v59 = vld [vmem:[#allocation4 + $0x3ac] ss:$16 sps:$4 sm:$0xff]   ;;  %v3920_v60 = vld [vmem:[#allocation4 + $0x3a0] ss:$16 sps:$4 sm:$0xff]  }
 0x1d1   :  { %2468 = vmatpush1.bf16.msra.mxu0 %v3842_v3  ;;  %2554 = vmatpush1.bf16.msra.mxu1 %v3845_v4  ;;  %v3923_v61 = vld [vmem:[#allocation4 + $0x3a8] ss:$16 sps:$4 sm:$0xff]   ;;  %v3928_v62 = vld [vmem:[#allocation4 + $0x3c4] ss:$16 sps:$4 sm:$0xff]   ;;  %v3931_v63 = vld [vmem:[#allocation4 + $0x3cc] ss:$16 sps:$4 sm:$0xff]  }
 0x1d2   :  { %2499 = vmatprep.mubr.bf16.mxu0 %v1633_v2  ;;  %2585 = vmatprep.mubr.bf16.mxu1 %v1633_v2  ;;  %v3926_v1 = vld [vmem:[#allocation4 + $0x3c0] ss:$16 sps:$4 sm:$0xff]   ;;  %v3929_v2 = vld [vmem:[#allocation4 + $0x3c8] ss:$16 sps:$4 sm:$0xff]   ;;  %v3934_v3 = vld [vmem:[#allocation4 + $0x3e4] ss:$16 sps:$4 sm:$0xff]  }
 0x1d3   :  { %2469 = vmatprep.subr.bf16.mxu0 %v3850_v5  ;;  %2555 = vmatprep.subr.bf16.mxu1 %v3853_v6  ;;  %v3937_v4 = vld [vmem:[#allocation4 + $0x3ec] ss:$16 sps:$4 sm:$0xff]   ;;  %v3932_v5 = vld [vmem:[#allocation4 + $0x3e0] ss:$16 sps:$4 sm:$0xff]   ;;  %v3935_v6 = vld [vmem:[#allocation4 + $0x3e8] ss:$16 sps:$4 sm:$0xff]  }
 0x1d5   :  { %2470 = vmatpush1.bf16.msra.mxu0 %v3848_v7  ;;  %2556 = vmatpush1.bf16.msra.mxu1 %v3851_v8  ;;  %v3938_v7 = vld [vmem:[%s4278_s5 + $0x40] sm:$0xff]  }
 0x1d6   :  { %2471 = vmatprep.subr.bf16.mxu0 %v3856_v9  ;;  %2557 = vmatprep.subr.bf16.mxu1 %v3859_v10  ;;  %v3939_v8 = vld [vmem:[%s4278_s5 + $0xc0] sm:$0xff]  }
 0x1d7   :  { %v3940_v9 = vld [vmem:[%s4278_s5] sm:$0xff]  }
 0x1d8   :  { %v3941_v10 = vld [vmem:[%s4278_s5 + $0x80] sm:$0xff]  }
 0x1d9   :  { %2472 = vmatpush1.bf16.msra.mxu0 %v3854_v11  ;;  %2558 = vmatpush1.bf16.msra.mxu1 %v3857_v12  ;;  %v3942_v11 = vld [vmem:[%s4278_s5 + $0x48] sm:$0xff]  }
 0x1da   :  { %2473 = vmatprep.subr.bf16.mxu0 %v3862_v13  ;;  %2559 = vmatprep.subr.bf16.mxu1 %v3865_v14  ;;  %v3943_v12 = vld [vmem:[%s4278_s5 + $0xc8] sm:$0xff]  }
 0x1db   :  { %v3944_v13 = vld [vmem:[%s4278_s5 + $0x8] sm:$0xff]  }
 0x1dc   :  { %v3945_v14 = vld [vmem:[%s4278_s5 + $0x88] sm:$0xff]  }
 0x1dd   :  { %2474 = vmatpush1.bf16.msra.mxu0 %v3860_v15  ;;  %2560 = vmatpush1.bf16.msra.mxu1 %v3863_v16  ;;  %v3946_v15 = vld [vmem:[%s4278_s5 + $0x50] sm:$0xff]  }
 0x1de   :  { %2475 = vmatprep.subr.bf16.mxu0 %v3868_v17  ;;  %2561 = vmatprep.subr.bf16.mxu1 %v3871_v18  ;;  %v3948_v16 = vld [vmem:[%s4278_s5 + $0x10] sm:$0xff]   ;;  %v3950_v18 = vld [vmem:[%s4278_s5 + $0x58] sm:$0xff]  }
 0x1df   :  { %v3949_v17 = vld [vmem:[%s4278_s5 + $0x90] sm:$0xff]  }
 0x1e1   :  { %2476 = vmatpush1.bf16.msra.mxu0 %v3866_v19  ;;  %2562 = vmatpush1.bf16.msra.mxu1 %v3869_v20  ;;  %v3951_v19 = vld [vmem:[%s4278_s5 + $0xd8] sm:$0xff]  }
 0x1e2   :  { %2477 = vmatprep.subr.bf16.mxu0 %v3874_v21  ;;  %2563 = vmatprep.subr.bf16.mxu1 %v3877_v22  ;;  %v3952_v20 = vld [vmem:[%s4278_s5 + $0x18] sm:$0xff]   ;;  %v3954_v22 = vld [vmem:[%s4278_s5 + $0x60] sm:$0xff]  }
 0x1e3   :  { %v3953_v21 = vld [vmem:[%s4278_s5 + $0x98] sm:$0xff]  }
 0x1e5   :  { %2478 = vmatpush1.bf16.msra.mxu0 %v3872_v23  ;;  %2564 = vmatpush1.bf16.msra.mxu1 %v3875_v24  ;;  %v3955_v23 = vld [vmem:[%s4278_s5 + $0xe0] sm:$0xff]  }
 0x1e6   :  { %2479 = vmatprep.subr.bf16.mxu0 %v3880_v25  ;;  %2565 = vmatprep.subr.bf16.mxu1 %v3883_v26  ;;  %v3956_v24 = vld [vmem:[%s4278_s5 + $0x20] sm:$0xff]   ;;  %v3958_v26 = vld [vmem:[%s4278_s5 + $0x68] sm:$0xff]  }
 0x1e7   :  { %v3957_v25 = vld [vmem:[%s4278_s5 + $0xa0] sm:$0xff]  }
 0x1e9   :  { %2480 = vmatpush1.bf16.msra.mxu0 %v3878_v27  ;;  %2566 = vmatpush1.bf16.msra.mxu1 %v3881_v28  ;;  %v3959_v27 = vld [vmem:[%s4278_s5 + $0xe8] sm:$0xff]  }
 0x1ea   :  { %2481 = vmatprep.subr.bf16.mxu0 %v3886_v32  ;;  %2567 = vmatprep.subr.bf16.mxu1 %v3889_v35  ;;  %v3960_v28 = vld [vmem:[%s4278_s5 + $0x28] sm:$0xff]   ;;  %v3962_v35 = vld [vmem:[%s4278_s5 + $0x70] sm:$0xff]  }
 0x1eb   :  { %v3961_v32 = vld [vmem:[%s4278_s5 + $0xa8] sm:$0xff]  }
 0x1ed   :  { %2482 = vmatpush1.bf16.msra.mxu0 %v3884_v36  ;;  %2568 = vmatpush1.bf16.msra.mxu1 %v3887_v37  ;;  %v3963_v36 = vld [vmem:[%s4278_s5 + $0xf0] sm:$0xff]  }
 0x1ee   :  { %2483 = vmatprep.subr.bf16.mxu0 %v3892_v38  ;;  %2569 = vmatprep.subr.bf16.mxu1 %v3895_v39  ;;  %v3964_v37 = vld [vmem:[%s4278_s5 + $0x30] sm:$0xff]   ;;  %v3966_v39 = vld [vmem:[%s4278_s5 + $0x78] sm:$0xff]  }
 0x1ef   :  { %v3965_v38 = vld [vmem:[%s4278_s5 + $0xb0] sm:$0xff]  }
 0x1f1   :  { %2484 = vmatpush1.bf16.msra.mxu0 %v3890_v40  ;;  %2570 = vmatpush1.bf16.msra.mxu1 %v3893_v41  ;;  %v3967_v40 = vld [vmem:[%s4278_s5 + $0xf8] sm:$0xff]  }
 0x1f2   :  { %2485 = vmatprep.subr.bf16.mxu0 %v3898_v42  ;;  %2571 = vmatprep.subr.bf16.mxu1 %v3901_v43  ;;  %v3968_v41 = vld [vmem:[%s4278_s5 + $0x38] sm:$0xff]   ;;  %v1762_v43 = vld [vmem:[%s4277_s4] sm:$0xf] }
 0x1f3   :  { %v3969_v42 = vld [vmem:[%s4278_s5 + $0xb8] sm:$0xff]  }
 0x1f5   :  { %2486 = vmatpush1.bf16.msra.mxu0 %v3896_v44  ;;  %2572 = vmatpush1.bf16.msra.mxu1 %v3899_v45  ;;  %v1767_v44 = vrot.slane %v1762_v43, %v276_v30  ;;  %v1775_v45 = vrot.slane %v1762_v43, %v284_v31 }
 0x1f6   :  { %2487 = vmatprep.subr.bf16.mxu0 %v3904_v46  ;;  %2573 = vmatprep.subr.bf16.mxu1 %v3907_v47  ;;  %v1771_v46 = vrot.slane %v1762_v43, %v280_v33  ;;  %v1779_v47 = vrot.slane %v1762_v43, %v288_v34 }
 0x1f9   :  { %2488 = vmatpush1.bf16.msra.mxu0 %v3902_v48  ;;  %2574 = vmatpush1.bf16.msra.mxu1 %v3905_v49 }
 0x1fa   :  { %2489 = vmatprep.subr.bf16.mxu0 %v3910_v50  ;;  %2575 = vmatprep.subr.bf16.mxu1 %v3913_v51 }
 0x1fd   :  { %2490 = vmatpush1.bf16.msra.mxu0 %v3908_v52  ;;  %2576 = vmatpush1.bf16.msra.mxu1 %v3911_v53 }
 0x1fe   :  { %2491 = vmatprep.subr.bf16.mxu0 %v3916_v54  ;;  %2577 = vmatprep.subr.bf16.mxu1 %v3919_v55 }
 0x201   :  { %2492 = vmatpush1.bf16.msra.mxu0 %v3914_v56  ;;  %2578 = vmatpush1.bf16.msra.mxu1 %v3917_v57 }
 0x202   :  { %2493 = vmatprep.subr.bf16.mxu0 %v3922_v58  ;;  %2579 = vmatprep.subr.bf16.mxu1 %v3925_v59 }
 0x205   :  { %2494 = vmatpush1.bf16.msra.mxu0 %v3920_v60  ;;  %2580 = vmatpush1.bf16.msra.mxu1 %v3923_v61 }
 0x206   :  { %2495 = vmatprep.subr.bf16.mxu0 %v3928_v62  ;;  %2581 = vmatprep.subr.bf16.mxu1 %v3931_v63 }
 0x209   :  { %2496 = vmatpush1.bf16.msra.mxu0 %v3926_v1  ;;  %2582 = vmatpush1.bf16.msra.mxu1 %v3929_v2 }
 0x20a   :  { %2497 = vmatprep.subr.bf16.mxu0 %v3934_v3  ;;  %2583 = vmatprep.subr.bf16.mxu1 %v3937_v4 }
 0x20d   :  { %2498 = vmatpush1.bf16.msra.mxu0 %v3932_v5  ;;  %2584 = vmatpush1.bf16.msra.mxu1 %v3935_v6 }
 0x20e   :  { %3355 = vmatprep.subr.bf16.mxu0 %v3938_v7  ;;  %3377 = vmatprep.subr.bf16.mxu1 %v3939_v8 }
 0x210   :  { %2500 = vmatmul.mubr.bf16.vlgmr.msra.gmra.mrb[4].mxu0 %v4156_v0  ;;  %2586 = vmatmul.mubr.bf16.vlgmr.msra.gmra.mrb[4].mxu1 %v4156_v0  ;;  %v3947_v0 = vld [vmem:[%s4278_s5 + $0xd0] sm:$0xff]  }
 0x211   :  { %3356 = vmatpush3.bf16.msra.mxu0 %v3940_v9  ;;  %3378 = vmatpush3.bf16.msra.mxu1 %v3941_v10  ;;  %v3313_v10 = vld [vmem:[%s4279_s6] ss:$0 sm:$0xff] }
 0x212   :  { %3357 = vmatprep.subr.bf16.mxu0 %v3942_v11  ;;  %3379 = vmatprep.subr.bf16.mxu1 %v3943_v12 }
 0x215   :  { %3358 = vmatpush3.bf16.msra.mxu0 %v3944_v13  ;;  %3380 = vmatpush3.bf16.msra.mxu1 %v3945_v14 }
 0x216   :  { %3359 = vmatprep.subr.bf16.mxu0 %v3946_v15  ;;  %3381 = vmatprep.subr.bf16.mxu1 %v3947_v0 }
 0x219   :  { %3360 = vmatpush3.bf16.msra.mxu0 %v3948_v16  ;;  %3382 = vmatpush3.bf16.msra.mxu1 %v3949_v17 }
 0x21a   :  { %3361 = vmatprep.subr.bf16.mxu0 %v3950_v18  ;;  %3383 = vmatprep.subr.bf16.mxu1 %v3951_v19 }
 0x21d   :  { %3362 = vmatpush3.bf16.msra.mxu0 %v3952_v20  ;;  %3384 = vmatpush3.bf16.msra.mxu1 %v3953_v21 }
 0x21e   :  { %3363 = vmatprep.subr.bf16.mxu0 %v3954_v22  ;;  %3385 = vmatprep.subr.bf16.mxu1 %v3955_v23 }
 0x221   :  { %3364 = vmatpush3.bf16.msra.mxu0 %v3956_v24  ;;  %3386 = vmatpush3.bf16.msra.mxu1 %v3957_v25 }
 0x222   :  { %3365 = vmatprep.subr.bf16.mxu0 %v3958_v26  ;;  %3387 = vmatprep.subr.bf16.mxu1 %v3959_v27 }
 0x225   :  { %3366 = vmatpush3.bf16.msra.mxu0 %v3960_v28  ;;  %3388 = vmatpush3.bf16.msra.mxu1 %v3961_v32 }
 0x226   :  { %3367 = vmatprep.subr.bf16.mxu0 %v3962_v35  ;;  %3389 = vmatprep.subr.bf16.mxu1 %v3963_v36 }
 0x229   :  { %3368 = vmatpush3.bf16.msra.mxu0 %v3964_v37  ;;  %3390 = vmatpush3.bf16.msra.mxu1 %v3965_v38 }
 0x22a   :  { %3369 = vmatprep.subr.bf16.mxu0 %v3966_v39  ;;  %3391 = vmatprep.subr.bf16.mxu1 %v3967_v40 }
 0x22d   :  { %3370 = vmatpush3.bf16.msra.mxu0 %v3968_v41  ;;  %3392 = vmatpush3.bf16.msra.mxu1 %v3969_v42 }
 0x2e3   :  { %v2501_v48 = vpop.f32.mrb[4].mxu0  ;;  %v2587_v49 = vpop.f32.mrb[4].mxu1 }
 0x2e4   :  { %v3407_v50 = vadd.f32 %v2501_v48, %v1767_v44  ;;  %v3411_v51 = vadd.f32 %v2587_v49, %v1775_v45  ;;  %v2503_v52 = vpop.f32.mrb[5].mxu0  ;;  %v2589_v53 = vpop.f32.mrb[5].mxu1 }
 0x2e5   :  { %v3408_v54 = vadd.f32 %v2503_v52, %v1771_v46  ;;  %v3412_v55 = vadd.f32 %v2589_v53, %v1779_v47  ;;  %v2505_v56 = vpop.f32.mrb[6].mxu0  ;;  %v2591_v57 = vpop.f32.mrb[6].mxu1 }
 0x2e6   :  { %v3409_v30 = vadd.f32 %v2505_v56, %v1767_v44  ;;  %v3413_v58 = vadd.f32 %v2591_v57, %v1775_v45  ;;  %v2507_v59 = vpop.f32.mrb[7].mxu0  ;;  %v2593_v31 = vpop.f32.mrb[7].mxu1  ;;  %v2596_v33 = vmax.f32 %v3407_v50, 0.0  ;;  %v2598_v62 = vmax.f32 %v3411_v51, 0.0 }
 0x2e7   :  { %v3410_v60 = vadd.f32 %v2507_v59, %v1771_v46  ;;  %v3414_v61 = vadd.f32 %v2593_v31, %v1779_v47  ;;  %v2597_v63 = vmax.f32 %v3408_v54, 0.0  ;;  %v2599_v1 = vmax.f32 %v3412_v55, 0.0 }
 0x2e8   :  { %v2600_v29 = vmax.f32 %v3409_v30, 0.0  ;;  %v2602_v34 = vmax.f32 %v3413_v58, 0.0 }
 0x2e9   :  { %v2601_v2 = vmax.f32 %v3410_v60, 0.0  ;;  %v2603_v3 = vmax.f32 %v3414_v61, 0.0 }
 0x2ea   :  { %v2604_v4 = vpack.c.bf16 %v2600_v29, %v2596_v33  ;;  %v2606_v5 = vpack.c.bf16 %v2602_v34, %v2598_v62 }
 0x2eb   :  { %v2605_v6 = vpack.c.bf16 %v2601_v2, %v2597_v63  ;;  %v2607_v7 = vpack.c.bf16 %v2603_v3, %v2599_v1 }
 0x2ed   :  { %2903 = vmatprep.mubr.bf16.mxu0 %v2605_v6  ;;  %2944 = vmatprep.mubr.bf16.mxu1 %v2607_v7 }
 0x2ee   :  { %2904 = vmatmul.mubr.bf16.vlgmr.msra.gmra.mrb[8].mxu0 %v2604_v4  ;;  %2945 = vmatmul.mubr.bf16.vlgmr.msra.gmra.mrb[8].mxu1 %v2606_v5 }
 0x3c1   :  { %v3371_v8 = vpop.f32.mrb[8].mxu0  ;;  %v3393_v9 = vpop.f32.mrb[8].mxu1 }
 0x3c2   :  { %v3372_v11 = vpop.f32.mrb[9].mxu0  ;;  %v3394_v12 = vpop.f32.mrb[9].mxu1 }
 0x3c3   :  { %v3373_v13 = vadd.f32 %v3372_v11, %v3371_v8  ;;  %v3395_v14 = vadd.f32 %v3394_v12, %v3393_v9  ;;  %v3374_v15 = vpop.f32.mrb[10].mxu0  ;;  %v3396_v0 = vpop.f32.mrb[10].mxu1 }
 0x3c4   :  { %v3375_v16 = vpop.f32.mrb[11].mxu0  ;;  %v3397_v17 = vpop.f32.mrb[11].mxu1 }
 0x3c5   :  { %v2906_v18 = vadd.f32 %v3373_v13, %v3313_v10  ;;  %v3376_v19 = vadd.f32 %v3375_v16, %v3374_v15  ;;  %v3398_v20 = vadd.f32 %v3397_v17, %v3396_v0 }
 0x3c7   :  { %v2909_v21 = vadd.f32 %v3376_v19, %v3313_v10  ;;  %v2947_v22 = vadd.f32 %v3395_v14, %v2906_v18 }
 0x3c9   :  { %2953 = vmax.xlane.f32.xlu0 %v2947_v22  ;;  %v2950_v23 = vadd.f32 %v3398_v20, %v2909_v21 }
 0x3cd   :  { %2955 = vmax.xlane.f32.xlu0 %v2950_v23 }
 0x456   :  { %v2954_v24 = vpop.xlane.xlu0 %2953 }
 0x457   :  { %v2957_v25 = vsub.f32 %v2947_v22, %v2954_v24 }
 0x459   :  { %v2959_v26 = vmul.f32 1.442695, %v2957_v25 }
 0x45a   :  { %v2956_v27 = vpop.xlane.xlu0 %2955 }
 0x45b   :  { %3970 = vpow2.f32 %v2959_v26  ;;  %v2958_v28 = vsub.f32 %v2950_v23, %v2956_v27 }
 0x45d   :  { %v2961_v32 = vmul.f32 1.442695, %v2958_v28 }
 0x45f   :  { %3972 = vpow2.f32 %v2961_v32 }
 0x465   :  { %v3971_v35 = vpop.eup %3970 }
 0x466   :  { %2963 = vadd.xlane.f32.xlu1 %v3971_v35 }
 0x469   :  { %v3973_v36 = vpop.eup %3972 }
 0x46a   :  { %2965 = vadd.xlane.f32.xlu1 %v3973_v36 }
 0x4f3   :  { %v2964_v37 = vpop.xlane.xlu1 %2963 }
 0x4f4   :  { %3974 = vrcp.f32 %v2964_v37 }
 0x4f7   :  { %v2966_v38 = vpop.xlane.xlu1 %2965 }
 0x4f8   :  { %3976 = vrcp.f32 %v2966_v38 }
 0x4fe   :  { %v3975_v39 = vpop.eup %3974 }
 0x4ff   :  { %v2968_v41 = vmul.f32 %v3975_v39, %v3971_v35 }
 0x502   :  { %v3977_v40 = vpop.eup %3976 }
 0x503   :  { %v2970_v42 = vmul.f32 %v3977_v40, %v3973_v36 }
 0x505   :  { %v3353_v43 = vpack.c.bf16 %v2970_v42, %v2968_v41 }
 0x507   :  { %3354 = vst [vmem:[%s4280_s7] sm:$0xff] %v3353_v43  }
 0x508   :  { %2985 = vsyncpa [#allocation3], 1 }
 0x509   :  { %2986 = vsyncpa [#allocation5], 1 }

</bundles_post_ra>
